<compile_context>
chip_gen: v6e
topology: v6e:2x2x1
jax: 0.10.0
libtpu: 0.0.40
codegen_flags: <defaults>
</compile_context>

<pallas_src>
import functools

import jax
import jax.numpy as jnp
from jax import lax
from jax.experimental import pallas as pl
from jax.experimental.pallas import tpu as pltpu


# ----------------------------------------------------------------------------
# Fused kernel: conv1+bn1+relu -> conv2+bn2 -> self-attention -> +x -> relu
# All activations are (C, HW) with HW on the lane axis.
# ----------------------------------------------------------------------------
def _block_kernel(x_ref, w1_ref, s1_ref, b1_ref, w2_ref, s2_ref, b2_ref,
                  wq_ref, bq_ref, wk_ref, bk_ref, wv_ref, bv_ref, g_ref,
                  o_ref, *, H, W, C8):
    HW = H * W
    x = x_ref[0]                                  # (C, HW) lane-dense

    # ---- 3x3 tap geometry (roll amount + border mask), shared by both convs.
    pos = lax.broadcasted_iota(jnp.int32, (1, HW), 1)
    if (W & (W - 1)) == 0:                        # power-of-two W: cheap bit ops
        col = jnp.bitwise_and(pos, W - 1)
    else:
        # TODO(synk): non-power-of-two W relies on vector integer division.
        col = pos - (pos // W) * W
    border = {
        (-1, 0): pos >= W,                        # has a row above
        (1, 0): pos < (H - 1) * W,                # has a row below
        (0, -1): col >= 1,                        # has a column to the left
        (0, 1): col <= W - 2,                     # has a column to the right
    }
    taps = []                                     # ordered (dy, dx) like HWIO weights
    for oy in (-1, 0, 1):
        for ox in (-1, 0, 1):
            cond = None
            if oy != 0:
                cond = border[(oy, 0)]
            if ox != 0:
                c2 = border[(0, ox)]
                cond = c2 if cond is None else jnp.logical_and(cond, c2)
            mask = None
            if cond is not None:
                mask = jnp.where(cond, 1.0, 0.0).astype(jnp.float32)  # (1, HW)
            amt = (-(oy * W + ox)) % HW           # roll amount on the HW (lane) axis
            taps.append((amt, mask))

    def conv3x3_bn(inp, wmat_ref, scale_ref, shift_ref):
        # inp: (Cin, HW); wmat_ref: (Cout, 9*Cin); scale/shift: (Cout, 1)
        cols = []
        for amt, mask in taps:
            t = pltpu.roll(inp, shift=amt, axis=1) if amt else inp
            if mask is not None:
                t = t * mask                      # zero out-of-image taps
            cols.append(t)
        patches = jnp.concatenate(cols, axis=0)   # (9*Cin, HW) im2col tile
        y = jnp.dot(wmat_ref[...], patches,
                    preferred_element_type=jnp.float32)   # one K=9*Cin matmul
        return y * scale_ref[...] + shift_ref[...]         # folded BatchNorm

    h1 = jnp.maximum(conv3x3_bn(x, w1_ref, s1_ref, b1_ref), 0.0)   # conv1+bn1+relu
    h2 = conv3x3_bn(h1, w2_ref, s2_ref, b2_ref)                    # conv2+bn2

    # ---- SelfAttention (1x1 convs as matmuls), lane-dense operands.
    q_row = jnp.dot(wq_ref[...], h2, preferred_element_type=jnp.float32) + bq_ref[...]  # (C8, HW)
    k_row = jnp.dot(wk_ref[...], h2, preferred_element_type=jnp.float32) + bk_ref[...]  # (C8, HW)
    v     = jnp.dot(wv_ref[...], h2, preferred_element_type=jnp.float32) + bv_ref[...]  # (C,  HW)

    q_col = jnp.transpose(q_row)                  # (HW, C8): queries on sublanes
    if C8 == 1:
        logits = q_col * k_row                    # rank-1 outer product on the VPU
    else:
        logits = jnp.dot(q_col, k_row, preferred_element_type=jnp.float32)

    m = jnp.max(logits, axis=-1, keepdims=True)   # softmax over keys (lane axis)
    p = jnp.exp(logits - m)
    attn = p * pl.reciprocal(jnp.sum(p, axis=-1, keepdims=True), approx=True)

    # out[c, i] = sum_j v[c, j] * attn[i, j]  (MXU-native transposed-RHS form)
    attn_v = lax.dot_general(v, attn, (((1,), (1,)), ((), ())),
                             preferred_element_type=jnp.float32)   # (C, HW)

    res = g_ref[0, 0] * attn_v + h2               # gamma*out + bn2 output
    o_ref[0] = jnp.maximum(res + x, 0.0)          # + identity, final ReLU


# ----------------------------------------------------------------------------
# Wrapper: flattens NCHW -> (N, C, HW) (free reshape), preps weight matrices.
# ----------------------------------------------------------------------------
def basic_attention_block(x_nchw, p):
    N, C, H, W = x_nchw.shape
    HW = H * W
    C8 = p["wq"].shape[0]

    x_flat = x_nchw.reshape(N, C, HW).astype(jnp.float32)

    def conv_mat(w):  # (3, 3, Cin, Cout) -> (Cout, 9*Cin), rows ordered (dy, dx, ci)
        kh, kw, cin, cout = w.shape
        return jnp.transpose(w.reshape(kh * kw * cin, cout))

    w1m = conv_mat(p["w1"])
    w2m = conv_mat(p["w2"])

    kernel = functools.partial(_block_kernel, H=H, W=W, C8=C8)
    out = pl.pallas_call(
        kernel,
        out_shape=jax.ShapeDtypeStruct((N, C, HW), jnp.float32),
        grid=(N,),
        in_specs=[
            pl.BlockSpec((1, C, HW), lambda b: (b, 0, 0)),   # x (identity)
            pl.BlockSpec((C, 9 * C), lambda b: (0, 0)),      # conv1 weights
            pl.BlockSpec((C, 1), lambda b: (0, 0)),          # bn1 scale
            pl.BlockSpec((C, 1), lambda b: (0, 0)),          # bn1 shift
            pl.BlockSpec((C, 9 * C), lambda b: (0, 0)),      # conv2 weights
            pl.BlockSpec((C, 1), lambda b: (0, 0)),          # bn2 scale
            pl.BlockSpec((C, 1), lambda b: (0, 0)),          # bn2 shift
            pl.BlockSpec((C8, C), lambda b: (0, 0)),         # wq (out, in)
            pl.BlockSpec((C8, 1), lambda b: (0, 0)),         # bq
            pl.BlockSpec((C8, C), lambda b: (0, 0)),         # wk (out, in)
            pl.BlockSpec((C8, 1), lambda b: (0, 0)),         # bk
            pl.BlockSpec((C, C), lambda b: (0, 0)),          # wv (out, in)
            pl.BlockSpec((C, 1), lambda b: (0, 0)),          # bv
            pl.BlockSpec((1, 1), lambda b: (0, 0)),          # gamma
        ],
        out_specs=pl.BlockSpec((1, C, HW), lambda b: (b, 0, 0)),
        compiler_params=pltpu.CompilerParams(
            dimension_semantics=("parallel",)),
    )(x_flat, w1m, p["scale1"].reshape(C, 1), p["shift1"].reshape(C, 1),
      w2m, p["scale2"].reshape(C, 1), p["shift2"].reshape(C, 1),
      p["wq"], p["bq"].reshape(C8, 1), p["wk"], p["bk"].reshape(C8, 1),
      p["wv"], p["bv"].reshape(C, 1), p["gamma"].reshape(1, 1))
    return out.reshape(N, C, H, W)


# ----------------------------------------------------------------------------
# Pure-JAX reference (same math, XLA ops) for the correctness check
# ----------------------------------------------------------------------------
def ref_forward(x_nchw, p):
    x = x_nchw.astype(jnp.float32)
    dn = ("NCHW", "HWIO", "NCHW")
    s1 = p["scale1"][None, :, None, None]; t1 = p["shift1"][None, :, None, None]
    s2 = p["scale2"][None, :, None, None]; t2 = p["shift2"][None, :, None, None]
    h = lax.conv_general_dilated(x, p["w1"], (1, 1), "SAME", dimension_numbers=dn)
    h = jnp.maximum(h * s1 + t1, 0.0)
    h = lax.conv_general_dilated(h, p["w2"], (1, 1), "SAME", dimension_numbers=dn)
    h = h * s2 + t2
    N, C, H, W = h.shape
    hf = h.reshape(N, C, H * W)
    q = jnp.einsum("oc,ncj->noj", p["wq"], hf) + p["bq"][None, :, None]
    k = jnp.einsum("oc,ncj->noj", p["wk"], hf) + p["bk"][None, :, None]
    v = jnp.einsum("oc,ncj->noj", p["wv"], hf) + p["bv"][None, :, None]
    attn = jax.nn.softmax(jnp.einsum("nci,ncj->nij", q, k), axis=-1)
    out = jnp.einsum("nij,ncj->nci", attn, v)
    res = p["gamma"] * out + hf
    y = jnp.maximum(res + x.reshape(N, C, H * W), 0.0)
    return y.reshape(N, C, H, W)


# ----------------------------------------------------------------------------
# Deterministic parameter construction (inference-folded BatchNorm)
# ----------------------------------------------------------------------------
def init_params(key, planes):
    eps = 1e-5
    c8 = max(planes // 8, 1)
    ks = jax.random.split(key, 16)

    def bn_fold(kg, kb, km, kv, c):
        gamma = 1.0 + 0.1 * jax.random.normal(kg, (c,), jnp.float32)
        beta = 0.1 * jax.random.normal(kb, (c,), jnp.float32)
        mean = 0.1 * jax.random.normal(km, (c,), jnp.float32)
        var = 1.0 + 0.1 * jax.random.uniform(kv, (c,), jnp.float32)
        scale = gamma / jnp.sqrt(var + eps)
        shift = beta - mean * scale
        return scale, shift

    scale1, shift1 = bn_fold(ks[2], ks[3], ks[4], ks[5], planes)
    scale2, shift2 = bn_fold(ks[6], ks[7], ks[8], ks[9], planes)
    return {
        "w1": 0.1 * jax.random.normal(ks[0], (3, 3, planes, planes), jnp.float32),
        "w2": 0.1 * jax.random.normal(ks[1], (3, 3, planes, planes), jnp.float32),
        "scale1": scale1, "shift1": shift1,
        "scale2": scale2, "shift2": shift2,
        "wq": 0.2 * jax.random.normal(ks[10], (c8, planes), jnp.float32),
        "bq": 0.05 * jnp.ones((c8,), jnp.float32),
        "wk": 0.2 * jax.random.normal(ks[11], (c8, planes), jnp.float32),
        "bk": -0.05 * jnp.ones((c8,), jnp.float32),
        "wv": 0.2 * jax.random.normal(ks[12], (planes, planes), jnp.float32),
        "bv": 0.02 * jnp.ones((planes,), jnp.float32),
        # PyTorch inits gamma to 0 (attention would be a no-op); nonzero so the
        # attention path is exercised.
        "gamma": jnp.array(0.5, jnp.float32),
    }


if __name__ == "__main__":
    key = jax.random.PRNGKey(0)
    kx, kp = jax.random.split(key)

    N, C, H, W = 2, 8, 16, 16        # in_planes == planes == 8 (downsample=None)
    x = jax.random.normal(kx, (N, C, H, W), jnp.float32)
    params = init_params(kp, planes=C)

    out = jax.jit(basic_attention_block)(x, params)
    out = jax.block_until_ready(out)

    ref = ref_forward(x, params)
    err = float(jnp.max(jnp.abs(out - ref)))
    assert out.shape == (N, C, H, W)
    assert jnp.allclose(out, ref, atol=2e-3, rtol=2e-3), err

    print("KERNEL_OK")
</pallas_src>

<mosaic_0001>
module attributes {stable_mosaic.version = 11 : i64} {
  func.func @_block_kernel(%arg0: i32, %arg1: memref<1x8x256xf32, #tpu.memory_space<vmem>>, %arg2: memref<8x72xf32, #tpu.memory_space<vmem>>, %arg3: memref<8x1xf32, #tpu.memory_space<vmem>>, %arg4: memref<8x1xf32, #tpu.memory_space<vmem>>, %arg5: memref<8x72xf32, #tpu.memory_space<vmem>>, %arg6: memref<8x1xf32, #tpu.memory_space<vmem>>, %arg7: memref<8x1xf32, #tpu.memory_space<vmem>>, %arg8: memref<1x8xf32, #tpu.memory_space<vmem>>, %arg9: memref<1x1xf32, #tpu.memory_space<vmem>>, %arg10: memref<1x8xf32, #tpu.memory_space<vmem>>, %arg11: memref<1x1xf32, #tpu.memory_space<vmem>>, %arg12: memref<8x8xf32, #tpu.memory_space<vmem>>, %arg13: memref<8x1xf32, #tpu.memory_space<vmem>>, %arg14: memref<1x1xf32, #tpu.memory_space<vmem>>, %arg15: memref<1x8x256xf32, #tpu.memory_space<vmem>>) attributes {dimension_semantics = [#tpu.dimension_semantics<parallel>], iteration_bounds = array<i64: 2>, scalar_prefetch = 0 : i64, scratch_operands = 0 : i64, tpu.core_type = #tpu.core_type<tc>, window_params = [{transform_indices = @transform_0, window_bounds = array<i64: 1, 8, 256>}, {pipeline_mode = #tpu.pipeline_mode<synchronous>, transform_indices = @transform_1, window_bounds = array<i64: 8, 72>}, {pipeline_mode = #tpu.pipeline_mode<synchronous>, transform_indices = @transform_2, window_bounds = array<i64: 8, 1>}, {pipeline_mode = #tpu.pipeline_mode<synchronous>, transform_indices = @transform_3, window_bounds = array<i64: 8, 1>}, {pipeline_mode = #tpu.pipeline_mode<synchronous>, transform_indices = @transform_4, window_bounds = array<i64: 8, 72>}, {pipeline_mode = #tpu.pipeline_mode<synchronous>, transform_indices = @transform_5, window_bounds = array<i64: 8, 1>}, {pipeline_mode = #tpu.pipeline_mode<synchronous>, transform_indices = @transform_6, window_bounds = array<i64: 8, 1>}, {pipeline_mode = #tpu.pipeline_mode<synchronous>, transform_indices = @transform_7, window_bounds = array<i64: 1, 8>}, {pipeline_mode = #tpu.pipeline_mode<synchronous>, transform_indices = @transform_8, window_bounds = array<i64: 1, 1>}, {pipeline_mode = #tpu.pipeline_mode<synchronous>, transform_indices = @transform_9, window_bounds = array<i64: 1, 8>}, {pipeline_mode = #tpu.pipeline_mode<synchronous>, transform_indices = @transform_10, window_bounds = array<i64: 1, 1>}, {pipeline_mode = #tpu.pipeline_mode<synchronous>, transform_indices = @transform_11, window_bounds = array<i64: 8, 8>}, {pipeline_mode = #tpu.pipeline_mode<synchronous>, transform_indices = @transform_12, window_bounds = array<i64: 8, 1>}, {pipeline_mode = #tpu.pipeline_mode<synchronous>, transform_indices = @transform_13, window_bounds = array<i64: 1, 1>}, {transform_indices = @transform_14, window_bounds = array<i64: 1, 8, 256>}]} {
    %c0 = arith.constant 0 : index
    %c0_0 = arith.constant 0 : index
    %c0_1 = arith.constant 0 : index
    %0 = vector.load %arg1[%c0, %c0_0, %c0_1] : memref<1x8x256xf32, #tpu.memory_space<vmem>>, vector<1x8x256xf32>
    %1 = vector.shape_cast %0 : vector<1x8x256xf32> to vector<8x256xf32>
    %2 = tpu.iota {dimensions = array<i32: 1>} : vector<1x256xi32>
    %c15_i32 = arith.constant 15 : i32
    %3 = vector.broadcast %c15_i32 : i32 to vector<1x256xi32>
    %4 = arith.andi %2, %3 : vector<1x256xi32>
    %c16_i32 = arith.constant 16 : i32
    %5 = vector.broadcast %c16_i32 : i32 to vector<1x256xi32>
    %6 = arith.cmpi sge, %2, %5 : vector<1x256xi32>
    %c240_i32 = arith.constant 240 : i32
    %7 = vector.broadcast %c240_i32 : i32 to vector<1x256xi32>
    %8 = arith.cmpi slt, %2, %7 : vector<1x256xi32>
    %c1_i32 = arith.constant 1 : i32
    %9 = vector.broadcast %c1_i32 : i32 to vector<1x256xi32>
    %10 = arith.cmpi sge, %4, %9 : vector<1x256xi32>
    %c14_i32 = arith.constant 14 : i32
    %11 = vector.broadcast %c14_i32 : i32 to vector<1x256xi32>
    %12 = arith.cmpi sle, %4, %11 : vector<1x256xi32>
    %13 = arith.andi %6, %10 : vector<1x256xi1>
    %cst = arith.constant 1.000000e+00 : f32
    %cst_2 = arith.constant 0.000000e+00 : f32
    %14 = vector.broadcast %cst : f32 to vector<1x256xf32>
    %15 = vector.broadcast %cst_2 : f32 to vector<1x256xf32>
    %16 = arith.select %13, %14, %15 : vector<1x256xi1>, vector<1x256xf32>
    %cst_3 = arith.constant 1.000000e+00 : f32
    %cst_4 = arith.constant 0.000000e+00 : f32
    %17 = vector.broadcast %cst_3 : f32 to vector<1x256xf32>
    %18 = vector.broadcast %cst_4 : f32 to vector<1x256xf32>
    %19 = arith.select %6, %17, %18 : vector<1x256xi1>, vector<1x256xf32>
    %20 = arith.andi %6, %12 : vector<1x256xi1>
    %cst_5 = arith.constant 1.000000e+00 : f32
    %cst_6 = arith.constant 0.000000e+00 : f32
    %21 = vector.broadcast %cst_5 : f32 to vector<1x256xf32>
    %22 = vector.broadcast %cst_6 : f32 to vector<1x256xf32>
    %23 = arith.select %20, %21, %22 : vector<1x256xi1>, vector<1x256xf32>
    %cst_7 = arith.constant 1.000000e+00 : f32
    %cst_8 = arith.constant 0.000000e+00 : f32
    %24 = vector.broadcast %cst_7 : f32 to vector<1x256xf32>
    %25 = vector.broadcast %cst_8 : f32 to vector<1x256xf32>
    %26 = arith.select %10, %24, %25 : vector<1x256xi1>, vector<1x256xf32>
    %cst_9 = arith.constant 1.000000e+00 : f32
    %cst_10 = arith.constant 0.000000e+00 : f32
    %27 = vector.broadcast %cst_9 : f32 to vector<1x256xf32>
    %28 = vector.broadcast %cst_10 : f32 to vector<1x256xf32>
    %29 = arith.select %12, %27, %28 : vector<1x256xi1>, vector<1x256xf32>
    %30 = arith.andi %8, %10 : vector<1x256xi1>
    %cst_11 = arith.constant 1.000000e+00 : f32
    %cst_12 = arith.constant 0.000000e+00 : f32
    %31 = vector.broadcast %cst_11 : f32 to vector<1x256xf32>
    %32 = vector.broadcast %cst_12 : f32 to vector<1x256xf32>
    %33 = arith.select %30, %31, %32 : vector<1x256xi1>, vector<1x256xf32>
    %cst_13 = arith.constant 1.000000e+00 : f32
    %cst_14 = arith.constant 0.000000e+00 : f32
    %34 = vector.broadcast %cst_13 : f32 to vector<1x256xf32>
    %35 = vector.broadcast %cst_14 : f32 to vector<1x256xf32>
    %36 = arith.select %8, %34, %35 : vector<1x256xi1>, vector<1x256xf32>
    %37 = arith.andi %8, %12 : vector<1x256xi1>
    %cst_15 = arith.constant 1.000000e+00 : f32
    %cst_16 = arith.constant 0.000000e+00 : f32
    %38 = vector.broadcast %cst_15 : f32 to vector<1x256xf32>
    %39 = vector.broadcast %cst_16 : f32 to vector<1x256xf32>
    %40 = arith.select %37, %38, %39 : vector<1x256xi1>, vector<1x256xf32>
    %c17_i32 = arith.constant 17 : i32
    %41 = tpu.dynamic_rotate %1 by %c17_i32 dim 1 : vector<8x256xf32>, i32 -> vector<8x256xf32>
    %42 = vector.broadcast %16 : vector<1x256xf32> to vector<8x256xf32>
    %43 = arith.mulf %41, %42 : vector<8x256xf32>
    %c16_i32_17 = arith.constant 16 : i32
    %44 = tpu.dynamic_rotate %1 by %c16_i32_17 dim 1 : vector<8x256xf32>, i32 -> vector<8x256xf32>
    %45 = vector.broadcast %19 : vector<1x256xf32> to vector<8x256xf32>
    %46 = arith.mulf %44, %45 : vector<8x256xf32>
    %c15_i32_18 = arith.constant 15 : i32
    %47 = tpu.dynamic_rotate %1 by %c15_i32_18 dim 1 : vector<8x256xf32>, i32 -> vector<8x256xf32>
    %48 = vector.broadcast %23 : vector<1x256xf32> to vector<8x256xf32>
    %49 = arith.mulf %47, %48 : vector<8x256xf32>
    %c1_i32_19 = arith.constant 1 : i32
    %50 = tpu.dynamic_rotate %1 by %c1_i32_19 dim 1 : vector<8x256xf32>, i32 -> vector<8x256xf32>
    %51 = vector.broadcast %26 : vector<1x256xf32> to vector<8x256xf32>
    %52 = arith.mulf %50, %51 : vector<8x256xf32>
    %c255_i32 = arith.constant 255 : i32
    %53 = tpu.dynamic_rotate %1 by %c255_i32 dim 1 : vector<8x256xf32>, i32 -> vector<8x256xf32>
    %54 = vector.broadcast %29 : vector<1x256xf32> to vector<8x256xf32>
    %55 = arith.mulf %53, %54 : vector<8x256xf32>
    %c241_i32 = arith.constant 241 : i32
    %56 = tpu.dynamic_rotate %1 by %c241_i32 dim 1 : vector<8x256xf32>, i32 -> vector<8x256xf32>
    %57 = vector.broadcast %33 : vector<1x256xf32> to vector<8x256xf32>
    %58 = arith.mulf %56, %57 : vector<8x256xf32>
    %c240_i32_20 = arith.constant 240 : i32
    %59 = tpu.dynamic_rotate %1 by %c240_i32_20 dim 1 : vector<8x256xf32>, i32 -> vector<8x256xf32>
    %60 = vector.broadcast %36 : vector<1x256xf32> to vector<8x256xf32>
    %61 = arith.mulf %59, %60 : vector<8x256xf32>
    %c239_i32 = arith.constant 239 : i32
    %62 = tpu.dynamic_rotate %1 by %c239_i32 dim 1 : vector<8x256xf32>, i32 -> vector<8x256xf32>
    %63 = vector.broadcast %40 : vector<1x256xf32> to vector<8x256xf32>
    %64 = arith.mulf %62, %63 : vector<8x256xf32>
    %65 = tpu.concatenate %43, %46, %49, %52, %1, %55, %58, %61, %64 in 0 : vector<8x256xf32>, vector<8x256xf32>, vector<8x256xf32>, vector<8x256xf32>, vector<8x256xf32>, vector<8x256xf32>, vector<8x256xf32>, vector<8x256xf32>, vector<8x256xf32> -> vector<72x256xf32>
    %c0_21 = arith.constant 0 : index
    %c0_22 = arith.constant 0 : index
    %66 = vector.load %arg2[%c0_21, %c0_22] : memref<8x72xf32, #tpu.memory_space<vmem>>, vector<8x72xf32>
    %cst_23 = arith.constant dense<0.000000e+00> : vector<8x256xf32>
    %67 = tpu.matmul %66, %65, %cst_23 {dimension_numbers = #tpu.dot_dimension_numbers<[1], [0], [0], [1], [0, 0, 1, 1], [], []>} : vector<8x72xf32>, vector<72x256xf32>, vector<8x256xf32> -> vector<8x256xf32>
    %c0_24 = arith.constant 0 : index
    %c0_25 = arith.constant 0 : index
    %68 = vector.load %arg3[%c0_24, %c0_25] : memref<8x1xf32, #tpu.memory_space<vmem>>, vector<8x1xf32>
    %69 = vector.broadcast %68 : vector<8x1xf32> to vector<8x256xf32>
    %70 = arith.mulf %67, %69 : vector<8x256xf32>
    %c0_26 = arith.constant 0 : index
    %c0_27 = arith.constant 0 : index
    %71 = vector.load %arg4[%c0_26, %c0_27] : memref<8x1xf32, #tpu.memory_space<vmem>>, vector<8x1xf32>
    %72 = vector.broadcast %71 : vector<8x1xf32> to vector<8x256xf32>
    %73 = arith.addf %70, %72 : vector<8x256xf32>
    %cst_28 = arith.constant 0.000000e+00 : f32
    %74 = vector.broadcast %cst_28 : f32 to vector<8x256xf32>
    %75 = arith.maximumf %73, %74 : vector<8x256xf32>
    %c17_i32_29 = arith.constant 17 : i32
    %76 = tpu.dynamic_rotate %75 by %c17_i32_29 dim 1 : vector<8x256xf32>, i32 -> vector<8x256xf32>
    %77 = vector.broadcast %16 : vector<1x256xf32> to vector<8x256xf32>
    %78 = arith.mulf %76, %77 : vector<8x256xf32>
    %c16_i32_30 = arith.constant 16 : i32
    %79 = tpu.dynamic_rotate %75 by %c16_i32_30 dim 1 : vector<8x256xf32>, i32 -> vector<8x256xf32>
    %80 = vector.broadcast %19 : vector<1x256xf32> to vector<8x256xf32>
    %81 = arith.mulf %79, %80 : vector<8x256xf32>
    %c15_i32_31 = arith.constant 15 : i32
    %82 = tpu.dynamic_rotate %75 by %c15_i32_31 dim 1 : vector<8x256xf32>, i32 -> vector<8x256xf32>
    %83 = vector.broadcast %23 : vector<1x256xf32> to vector<8x256xf32>
    %84 = arith.mulf %82, %83 : vector<8x256xf32>
    %c1_i32_32 = arith.constant 1 : i32
    %85 = tpu.dynamic_rotate %75 by %c1_i32_32 dim 1 : vector<8x256xf32>, i32 -> vector<8x256xf32>
    %86 = vector.broadcast %26 : vector<1x256xf32> to vector<8x256xf32>
    %87 = arith.mulf %85, %86 : vector<8x256xf32>
    %c255_i32_33 = arith.constant 255 : i32
    %88 = tpu.dynamic_rotate %75 by %c255_i32_33 dim 1 : vector<8x256xf32>, i32 -> vector<8x256xf32>
    %89 = vector.broadcast %29 : vector<1x256xf32> to vector<8x256xf32>
    %90 = arith.mulf %88, %89 : vector<8x256xf32>
    %c241_i32_34 = arith.constant 241 : i32
    %91 = tpu.dynamic_rotate %75 by %c241_i32_34 dim 1 : vector<8x256xf32>, i32 -> vector<8x256xf32>
    %92 = vector.broadcast %33 : vector<1x256xf32> to vector<8x256xf32>
    %93 = arith.mulf %91, %92 : vector<8x256xf32>
    %c240_i32_35 = arith.constant 240 : i32
    %94 = tpu.dynamic_rotate %75 by %c240_i32_35 dim 1 : vector<8x256xf32>, i32 -> vector<8x256xf32>
    %95 = vector.broadcast %36 : vector<1x256xf32> to vector<8x256xf32>
    %96 = arith.mulf %94, %95 : vector<8x256xf32>
    %c239_i32_36 = arith.constant 239 : i32
    %97 = tpu.dynamic_rotate %75 by %c239_i32_36 dim 1 : vector<8x256xf32>, i32 -> vector<8x256xf32>
    %98 = vector.broadcast %40 : vector<1x256xf32> to vector<8x256xf32>
    %99 = arith.mulf %97, %98 : vector<8x256xf32>
    %100 = tpu.concatenate %78, %81, %84, %87, %75, %90, %93, %96, %99 in 0 : vector<8x256xf32>, vector<8x256xf32>, vector<8x256xf32>, vector<8x256xf32>, vector<8x256xf32>, vector<8x256xf32>, vector<8x256xf32>, vector<8x256xf32>, vector<8x256xf32> -> vector<72x256xf32>
    %c0_37 = arith.constant 0 : index
    %c0_38 = arith.constant 0 : index
    %101 = vector.load %arg5[%c0_37, %c0_38] : memref<8x72xf32, #tpu.memory_space<vmem>>, vector<8x72xf32>
    %cst_39 = arith.constant dense<0.000000e+00> : vector<8x256xf32>
    %102 = tpu.matmul %101, %100, %cst_39 {dimension_numbers = #tpu.dot_dimension_numbers<[1], [0], [0], [1], [0, 0, 1, 1], [], []>} : vector<8x72xf32>, vector<72x256xf32>, vector<8x256xf32> -> vector<8x256xf32>
    %c0_40 = arith.constant 0 : index
    %c0_41 = arith.constant 0 : index
    %103 = vector.load %arg6[%c0_40, %c0_41] : memref<8x1xf32, #tpu.memory_space<vmem>>, vector<8x1xf32>
    %104 = vector.broadcast %103 : vector<8x1xf32> to vector<8x256xf32>
    %105 = arith.mulf %102, %104 : vector<8x256xf32>
    %c0_42 = arith.constant 0 : index
    %c0_43 = arith.constant 0 : index
    %106 = vector.load %arg7[%c0_42, %c0_43] : memref<8x1xf32, #tpu.memory_space<vmem>>, vector<8x1xf32>
    %107 = vector.broadcast %106 : vector<8x1xf32> to vector<8x256xf32>
    %108 = arith.addf %105, %107 : vector<8x256xf32>
    %c0_44 = arith.constant 0 : index
    %c0_45 = arith.constant 0 : index
    %109 = vector.load %arg8[%c0_44, %c0_45] : memref<1x8xf32, #tpu.memory_space<vmem>>, vector<1x8xf32>
    %cst_46 = arith.constant dense<0.000000e+00> : vector<1x256xf32>
    %110 = tpu.matmul %109, %108, %cst_46 {dimension_numbers = #tpu.dot_dimension_numbers<[1], [0], [0], [1], [0, 0, 1, 1], [], []>} : vector<1x8xf32>, vector<8x256xf32>, vector<1x256xf32> -> vector<1x256xf32>
    %c0_47 = arith.constant 0 : index
    %c0_48 = arith.constant 0 : index
    %111 = vector.load %arg9[%c0_47, %c0_48] : memref<1x1xf32, #tpu.memory_space<vmem>>, vector<1x1xf32>
    %112 = vector.broadcast %111 : vector<1x1xf32> to vector<1x256xf32>
    %113 = arith.addf %110, %112 : vector<1x256xf32>
    %c0_49 = arith.constant 0 : index
    %c0_50 = arith.constant 0 : index
    %114 = vector.load %arg10[%c0_49, %c0_50] : memref<1x8xf32, #tpu.memory_space<vmem>>, vector<1x8xf32>
    %cst_51 = arith.constant dense<0.000000e+00> : vector<1x256xf32>
    %115 = tpu.matmul %114, %108, %cst_51 {dimension_numbers = #tpu.dot_dimension_numbers<[1], [0], [0], [1], [0, 0, 1, 1], [], []>} : vector<1x8xf32>, vector<8x256xf32>, vector<1x256xf32> -> vector<1x256xf32>
    %c0_52 = arith.constant 0 : index
    %c0_53 = arith.constant 0 : index
    %116 = vector.load %arg11[%c0_52, %c0_53] : memref<1x1xf32, #tpu.memory_space<vmem>>, vector<1x1xf32>
    %117 = vector.broadcast %116 : vector<1x1xf32> to vector<1x256xf32>
    %118 = arith.addf %115, %117 : vector<1x256xf32>
    %c0_54 = arith.constant 0 : index
    %c0_55 = arith.constant 0 : index
    %119 = vector.load %arg12[%c0_54, %c0_55] : memref<8x8xf32, #tpu.memory_space<vmem>>, vector<8x8xf32>
    %cst_56 = arith.constant dense<0.000000e+00> : vector<8x256xf32>
    %120 = tpu.matmul %119, %108, %cst_56 {dimension_numbers = #tpu.dot_dimension_numbers<[1], [0], [0], [1], [0, 0, 1, 1], [], []>} : vector<8x8xf32>, vector<8x256xf32>, vector<8x256xf32> -> vector<8x256xf32>
    %c0_57 = arith.constant 0 : index
    %c0_58 = arith.constant 0 : index
    %121 = vector.load %arg13[%c0_57, %c0_58] : memref<8x1xf32, #tpu.memory_space<vmem>>, vector<8x1xf32>
    %122 = vector.broadcast %121 : vector<8x1xf32> to vector<8x256xf32>
    %123 = arith.addf %120, %122 : vector<8x256xf32>
    %124 = tpu.transpose %113, [1, 0] : vector<1x256xf32> -> vector<256x1xf32>
    %125 = vector.broadcast %124 : vector<256x1xf32> to vector<256x256xf32>
    %126 = vector.broadcast %118 : vector<1x256xf32> to vector<256x256xf32>
    %127 = arith.mulf %125, %126 : vector<256x256xf32>
    %cst_59 = arith.constant dense<0xFF800000> : vector<256xf32>
    %128 = vector.multi_reduction <maximumf>, %127, %cst_59 [1] : vector<256x256xf32> to vector<256xf32>
    %129 = vector.shape_cast %128 : vector<256xf32> to vector<256x1xf32>
    %130 = vector.broadcast %129 : vector<256x1xf32> to vector<256x256xf32>
    %131 = arith.subf %127, %130 : vector<256x256xf32>
    %132 = math.exp %131 : vector<256x256xf32>
    %cst_60 = arith.constant dense<0.000000e+00> : vector<256xf32>
    %133 = vector.multi_reduction <add>, %132, %cst_60 [1] : vector<256x256xf32> to vector<256xf32>
    %134 = vector.shape_cast %133 : vector<256xf32> to vector<256x1xf32>
    %135 = tpu.reciprocal %134 {approx = true} : vector<256x1xf32> -> vector<256x1xf32>
    %136 = vector.broadcast %135 : vector<256x1xf32> to vector<256x256xf32>
    %137 = arith.mulf %132, %136 : vector<256x256xf32>
    %cst_61 = arith.constant dense<0.000000e+00> : vector<8x256xf32>
    %138 = tpu.matmul %123, %137, %cst_61 {dimension_numbers = #tpu.dot_dimension_numbers<[1], [1], [0], [0], [0, 0, 1, 0], [], []>} : vector<8x256xf32>, vector<256x256xf32>, vector<8x256xf32> -> vector<8x256xf32>
    %c0_62 = arith.constant 0 : index
    %c0_63 = arith.constant 0 : index
    %139 = vector.load %arg14[%c0_62, %c0_63] : memref<1x1xf32, #tpu.memory_space<vmem>>, vector<1x1xf32>
    %140 = vector.extract %139[0, 0] : f32 from vector<1x1xf32>
    %141 = vector.broadcast %140 : f32 to vector<8x256xf32>
    %142 = arith.mulf %141, %138 : vector<8x256xf32>
    %143 = arith.addf %142, %108 : vector<8x256xf32>
    %144 = arith.addf %143, %1 : vector<8x256xf32>
    %cst_64 = arith.constant 0.000000e+00 : f32
    %145 = vector.broadcast %cst_64 : f32 to vector<8x256xf32>
    %146 = arith.maximumf %144, %145 : vector<8x256xf32>
    %c0_65 = arith.constant 0 : index
    %c0_66 = arith.constant 0 : index
    %c0_67 = arith.constant 0 : index
    %147 = vector.load %arg15[%c0_65, %c0_66, %c0_67] : memref<1x8x256xf32, #tpu.memory_space<vmem>>, vector<1x8x256xf32>
    %148 = vector.shape_cast %147 : vector<1x8x256xf32> to vector<8x256xf32>
    %149 = vector.shape_cast %146 : vector<8x256xf32> to vector<1x8x256xf32>
    tpu.vector_store %arg15[%c0_65, %c0_66, %c0_67], %149 {strides = array<i32>} : memref<1x8x256xf32, #tpu.memory_space<vmem>>, vector<1x8x256xf32>,
    return
  }
  func.func @transform_0(%arg0: i32) -> (i32, i32, i32) {
    %c0_i32 = arith.constant 0 : i32
    %c0_i32_0 = arith.constant 0 : i32
    %c0_i32_1 = arith.constant 0 : i32
    return %arg0, %c0_i32, %c0_i32_0 : i32, i32, i32
  }
  func.func @transform_1(%arg0: i32) -> (i32, i32) {
    %c0_i32 = arith.constant 0 : i32
    %c0_i32_0 = arith.constant 0 : i32
    %c0_i32_1 = arith.constant 0 : i32
    return %c0_i32, %c0_i32_0 : i32, i32
  }
  func.func @transform_2(%arg0: i32) -> (i32, i32) {
    %c0_i32 = arith.constant 0 : i32
    %c0_i32_0 = arith.constant 0 : i32
    %c0_i32_1 = arith.constant 0 : i32
    return %c0_i32, %c0_i32_0 : i32, i32
  }
  func.func @transform_3(%arg0: i32) -> (i32, i32) {
    %c0_i32 = arith.constant 0 : i32
    %c0_i32_0 = arith.constant 0 : i32
    %c0_i32_1 = arith.constant 0 : i32
    return %c0_i32, %c0_i32_0 : i32, i32
  }
  func.func @transform_4(%arg0: i32) -> (i32, i32) {
    %c0_i32 = arith.constant 0 : i32
    %c0_i32_0 = arith.constant 0 : i32
    %c0_i32_1 = arith.constant 0 : i32
    return %c0_i32, %c0_i32_0 : i32, i32
  }
  func.func @transform_5(%arg0: i32) -> (i32, i32) {
    %c0_i32 = arith.constant 0 : i32
    %c0_i32_0 = arith.constant 0 : i32
    %c0_i32_1 = arith.constant 0 : i32
    return %c0_i32, %c0_i32_0 : i32, i32
  }
  func.func @transform_6(%arg0: i32) -> (i32, i32) {
    %c0_i32 = arith.constant 0 : i32
    %c0_i32_0 = arith.constant 0 : i32
    %c0_i32_1 = arith.constant 0 : i32
    return %c0_i32, %c0_i32_0 : i32, i32
  }
  func.func @transform_7(%arg0: i32) -> (i32, i32) {
    %c0_i32 = arith.constant 0 : i32
    %c0_i32_0 = arith.constant 0 : i32
    %c0_i32_1 = arith.constant 0 : i32
    return %c0_i32, %c0_i32_0 : i32, i32
  }
  func.func @transform_8(%arg0: i32) -> (i32, i32) {
    %c0_i32 = arith.constant 0 : i32
    %c0_i32_0 = arith.constant 0 : i32
    %c0_i32_1 = arith.constant 0 : i32
    return %c0_i32, %c0_i32_0 : i32, i32
  }
  func.func @transform_9(%arg0: i32) -> (i32, i32) {
    %c0_i32 = arith.constant 0 : i32
    %c0_i32_0 = arith.constant 0 : i32
    %c0_i32_1 = arith.constant 0 : i32
    return %c0_i32, %c0_i32_0 : i32, i32
  }
  func.func @transform_10(%arg0: i32) -> (i32, i32) {
    %c0_i32 = arith.constant 0 : i32
    %c0_i32_0 = arith.constant 0 : i32
    %c0_i32_1 = arith.constant 0 : i32
    return %c0_i32, %c0_i32_0 : i32, i32
  }
  func.func @transform_11(%arg0: i32) -> (i32, i32) {
    %c0_i32 = arith.constant 0 : i32
    %c0_i32_0 = arith.constant 0 : i32
    %c0_i32_1 = arith.constant 0 : i32
    return %c0_i32, %c0_i32_0 : i32, i32
  }
  func.func @transform_12(%arg0: i32) -> (i32, i32) {
    %c0_i32 = arith.constant 0 : i32
    %c0_i32_0 = arith.constant 0 : i32
    %c0_i32_1 = arith.constant 0 : i32
    return %c0_i32, %c0_i32_0 : i32, i32
  }
  func.func @transform_13(%arg0: i32) -> (i32, i32) {
    %c0_i32 = arith.constant 0 : i32
    %c0_i32_0 = arith.constant 0 : i32
    %c0_i32_1 = arith.constant 0 : i32
    return %c0_i32, %c0_i32_0 : i32, i32
  }
  func.func @transform_14(%arg0: i32) -> (i32, i32, i32) {
    %c0_i32 = arith.constant 0 : i32
    %c0_i32_0 = arith.constant 0 : i32
    %c0_i32_1 = arith.constant 0 : i32
    return %arg0, %c0_i32, %c0_i32_0 : i32, i32, i32
  }
}

</mosaic_0001>

<bundles_post_ra>
// kernel: basic_attention_block.1
= control target key start
LH: loop header
LB: loop body
LE: loop exit
PB: predicated region body
PF: predicated region fallthrough
CT: control target
= control target key end

     0   :  { %s2337_s19 = smov 0   ;;  %s3302_s0 = inlined_call_operand.vmem [shape: f32[2,8,256], index: 0, kind: input, shape index: {}]   ;;  %s3303_s1 = inlined_call_operand.vmem [shape: f32[8,72], index: 1, kind: input, shape index: {}]   ;;  %s3304_s2 = inlined_call_operand.vmem [shape: f32[8,1], index: 2, kind: input, shape index: {}]   ;;  %s3305_s3 = inlined_call_operand.vmem [shape: f32[8,1], index: 3, kind: input, shape index: {}]   ;;  %s3306_s4 = inlined_call_operand.vmem [shape: f32[8,72], index: 4, kind: input, shape index: {}]   ;;  %s3307_s5 = inlined_call_operand.vmem [shape: f32[8,1], index: 5, kind: input, shape index: {}]   ;;  %s3308_s6 = inlined_call_operand.vmem [shape: f32[8,1], index: 6, kind: input, shape index: {}]   ;;  %s3309_s7 = inlined_call_operand.vmem [shape: f32[1,8], index: 7, kind: input, shape index: {}]   ;;  %s3310_s8 = inlined_call_operand.<no memory space> [shape: f32[1,1], index: 8, kind: input, shape index: {}]   ;;  %s3311_s9 = inlined_call_operand.vmem [shape: f32[1,8], index: 9, kind: input, shape index: {}]   ;;  %s3312_s11 = inlined_call_operand.vmem [shape: f32[8,8], index: 11, kind: input, shape index: {}]   ;;  %s3313_s12 = inlined_call_operand.vmem [shape: f32[8,1], index: 12, kind: input, shape index: {}]   ;;  %s3314_s14 = inlined_call_operand.vmem [shape: f32[2,8,256], index: 14, kind: output, shape index: {}]   ;;  %s3315_s10 = inlined_call_operand.<no memory space> [shape: f32[1,1], index: 10, kind: input, shape index: {}]   ;;  %s3316_s13 = inlined_call_operand.<no memory space> [shape: f32[1,1], index: 13, kind: input, shape index: {}]  }
   0x1   :  { %v19_v0 = vstv %s3310_s8  ;;  %v21_v1 = vstv %s3315_s10  ;;  %v23_v2 = vstv %s3316_s13 }
   0x2   :  { %20 = vst [vmem:[#allocation2] sm:$0x1] %v19_v0  ;;  %22 = vst [vmem:[#allocation3] sm:$0x1] %v21_v1 }
   0x3   :  { %24 = vst [vmem:[#allocation4] sm:$0x1] %v23_v2 }
   0x4 LB: > { %s2001_s8 = sadd.s32 4294967295, %s2241_s19   ;;  %p2005_p0 = scmp.ge.s32.totalorder %s2241_s19, 1  ;;  %s2241_s19 = sphi %s2337_s19, %s30_s19  }
   0x5   : > { %p418_p1 = scmp.lt.s32.totalorder %s2241_s19, 3 }
   0x7   : > { %p419_p2 = pnand %p2005_p0, %p418_p1 }
   0x9   : > { %422 = sbr.rel (%p419_p2) target bundleno = 1917 (0x77d), region = 76 }
   0xe   : > { %p464_p3 = scmp.lt.s32.totalorder %s2001_s8, 1  ;;  %v2243_v3 = vmov 0.0   ;;  %s2244_s22 = smov 112   ;;  %v2250_v6 = vmov 0   ;;  %v661_v7 = vld [vmem:[%s3304_s2] sm:$0xff]  ;;  %v476_v9 = vlaneseq }
   0xf   : > { %654 = vmatprep.mubr.f32.mxu0 %v2243_v3  ;;  %s2245_s23 = smov 111   ;;  %s2246_s24 = smov 113   ;;  %2039 = vset.pattern.permute.xlu0 %v2250_v6  ;;  %v669_v8 = vld [vmem:[%s3305_s3] sm:$0xff] }
  0x10   : > { %s3416_s8 = smov (!%p464_p3, %s2001_s8), 1  ;;  %s2247_s25 = smov 127   ;;  %2040 = vset.pattern.permute.xlu1 %v2250_v6  ;;  %v2401_v10 = vand.u32 127, %v476_v9 }
  0x11   : > { %s2017_s10 = sshll.u32 %s3416_s8, 4  ;;  %s2248_s26 = smov 1  }
  0x12   : > { %s2354_s21 = scalar_lea.vmem %s3302_s0, %s2017_s10  ;;  %s2249_s27 = smov 15   ;;  %v478_v11 = vadd.s32 128, %v2401_v10  ;;  %v479_v13 = vand.u32 15, %v2401_v10  ;;  %vm571_vm5 = vcmp.lt.s32.totalorder %v2401_v10, 112  ;;  %vm580_vm6 = vcmp.lt.s32.totalorder %v2401_v10, 111 }
  0x13   : > { %v2357_v4 = vld [vmem:[%s2354_s21] sm:$0xff]  ;;  %v2364_v5 = vld [vmem:[%s2354_s21 + $0x8] sm:$0xff]  ;;  %s2251_s28 = smov 16   ;;  %s2252_s29 = smov 17   ;;  %vm562_vm9 = vcmp.lt.s32.totalorder %v2401_v10, 113  ;;  %vm553_vm10 = vcmp.lt.s32.totalorder %v2401_v10, 127 }
  0x14   : > { %567 = vrot.lane.b32.xlu1 %v2357_v4, %s2244_s22  ;;  %576 = vrot.lane.b32.xlu0 %v2357_v4, %s2245_s23  ;;  %v480_v12 = vand.u32 15, %v478_v11  ;;  %vm484_vm0 = vcmp.lt.s32.totalorder %v478_v11, 240  ;;  %vm2412_vm3 = vcmp.le.s32.totalorder %v479_v13, 14  ;;  %vm2433_vm8 = vcmp.ge.s32.totalorder %v479_v13, 1  ;;  %v585_v13 = vld [vmem:[%s3303_s1] sm:$0xff] }
  0x15   : > { %v2428_v20 = vsel %vm2412_vm3, 1.0, %v2243_v3  ;;  %v2445_v27 = vsel %vm484_vm0, 1.0, %v2243_v3  ;;  %v2456_v31 = vsel %vm2433_vm8, 1.0, %v2243_v3  ;;  %vm481_vm11 = vcmp.ge.s32.totalorder %v2401_v10, 16 }
  0x16   : > { %vm2405_vm1 = vcmp.le.s32.totalorder %v480_v12, 14  ;;  %vm2416_vm4 = vcmp.ge.s32.totalorder %v480_v12, 1  ;;  %vm544_vm12 = vcmp.lt.s32.totalorder %v2401_v10, 1  ;;  %vm495_vm13 = vmand %vm481_vm11, %vm2412_vm3  ;;  %vm535_vm14 = vcmp.lt.s32.totalorder %v2401_v10, 15 }
  0x17   : > { %vm510_vm2 = vmand %vm484_vm0, %vm2405_vm1  ;;  %v2471_v40 = vsel %vm2405_vm1, 1.0, %v2243_v3  ;;  %v2484_v47 = vsel %vm2416_vm4, 1.0, %v2243_v3  ;;  %v2500_v54 = vsel %vm495_vm13, 1.0, %v2243_v3  ;;  %vm526_vm15 = vcmp.lt.s32.totalorder %v2401_v10, 16 }
  0x18   : > { %569 = vrot.lane.b32.xlu1 %v2364_v5, %s2244_s22  ;;  %578 = vrot.lane.b32.xlu0 %v2364_v5, %s2245_s23  ;;  %v2423_v19 = vsel %vm510_vm2, 1.0, %v2243_v3  ;;  %vm504_vm7 = vmand %vm484_vm0, %vm2416_vm4  ;;  %v2512_v61 = vsel %vm481_vm11, 1.0, %v2243_v3  ;;  %vm517_vm1 = vcmp.lt.s32.totalorder %v2401_v10, 17  ;;  %vm586_vm2 = vcmask 588800  }
  0x19   : > { %v2451_v30 = vsel %vm504_vm7, 1.0, %v2243_v3  ;;  %vm489_vm0 = vmand %vm481_vm11, %vm2433_vm8  ;;  %vm845_vm3 = vcmask 64512  }
  0x1c   : > { %560 = vrot.lane.b32.xlu1 %v2364_v5, %s2246_s24  ;;  %558 = vrot.lane.b32.xlu0 %v2357_v4, %s2246_s24 }
  0x20   : > { %551 = vrot.lane.b32.xlu1 %v2364_v5, %s2247_s25  ;;  %549 = vrot.lane.b32.xlu0 %v2357_v4, %s2247_s25 }
  0x24   : > { %542 = vrot.lane.b32.xlu1 %v2364_v5, %s2248_s26  ;;  %540 = vrot.lane.b32.xlu0 %v2357_v4, %s2248_s26 }
  0x28   : > { %533 = vrot.lane.b32.xlu1 %v2364_v5, %s2249_s27  ;;  %531 = vrot.lane.b32.xlu0 %v2357_v4, %s2249_s27 }
  0x2c   : > { %524 = vrot.lane.b32.xlu1 %v2364_v5, %s2251_s28  ;;  %522 = vrot.lane.b32.xlu0 %v2357_v4, %s2251_s28 }
  0x30   : > { %515 = vrot.lane.b32.xlu1 %v2364_v5, %s2252_s29  ;;  %513 = vrot.lane.b32.xlu0 %v2357_v4, %s2252_s29 }
  0x34   : > { %664 = vperm.xlu0 %2039, %v661_v7   ;;  %672 = vperm.xlu1 %2040, %v669_v8  }
  0x86   : > { %v568_v15 = vpop.permute.xlu1 %567  ;;  %v577_v16 = vpop.permute.xlu0 %576 }
  0x8a   : > { %v570_v21 = vpop.permute.xlu1 %569  ;;  %v579_v22 = vpop.permute.xlu0 %578 }
  0x8b   : > { %v573_v24 = vsel %vm571_vm5, %v570_v21, %v568_v15  ;;  %v582_v25 = vsel %vm580_vm6, %v579_v22, %v577_v16  ;;  %v581_v26 = vsel %vm580_vm6, %v577_v16, %v579_v22  ;;  %v572_v37 = vsel %vm571_vm5, %v568_v15, %v570_v21 }
  0x8c   : > { %v584_v28 = vmul.f32 %v582_v25, %v2423_v19  ;;  %v583_v29 = vmul.f32 %v581_v26, %v2428_v20  ;;  %v575_v34 = vmul.f32 %v573_v24, %v2445_v27  ;;  %v818_v26 = vld [vmem:[%s3307_s5] sm:$0xff] }
  0x8e   : > { %v561_v32 = vpop.permute.xlu1 %560  ;;  %604 = vmatprep.subr.mxu0 %v584_v28  ;;  %v559_v33 = vpop.permute.xlu0 %558  ;;  %v826_v28 = vld [vmem:[%s3308_s6] sm:$0xff] }
  0x8f   : > { %v563_v35 = vsel %vm562_vm9, %v559_v33, %v561_v32  ;;  %v564_v36 = vsel %vm562_vm9, %v561_v32, %v559_v33  ;;  %605 = vmatpush1.msra.mxu0 %v583_v29  ;;  %v835_v29 = vld [vmem:[#allocation2] sm:$0x1]  ;;  %v921_v32 = vld [vmem:[#allocation3] sm:$0x1] }
  0x90   : > { %606 = vmatprep.subr.mxu0 %v575_v34  ;;  %v566_v38 = vmul.f32 %v564_v36, %v2451_v30  ;;  %v565_v39 = vmul.f32 %v563_v35, %v2456_v31 }
  0x91   : > { %607 = vmatpush1.msra.mxu0 %v572_v37 }
  0x92   : > { %v552_v41 = vpop.permute.xlu1 %551  ;;  %608 = vmatprep.subr.mxu0 %v566_v38  ;;  %v550_v42 = vpop.permute.xlu0 %549 }
  0x93   : > { %v554_v43 = vsel %vm553_vm10, %v550_v42, %v552_v41  ;;  %v555_v44 = vsel %vm553_vm10, %v552_v41, %v550_v42  ;;  %609 = vmatpush1.msra.mxu0 %v565_v39 }
  0x94   : > { %v557_v45 = vmul.f32 %v555_v44, %v2471_v40  ;;  %v556_v46 = vmul.f32 %v554_v43, %v2428_v20 }
  0x96   : > { %v543_v48 = vpop.permute.xlu1 %542  ;;  %610 = vmatprep.subr.mxu0 %v557_v45  ;;  %v541_v49 = vpop.permute.xlu0 %540 }
  0x97   : > { %v545_v50 = vsel %vm544_vm12, %v541_v49, %v543_v48  ;;  %v546_v51 = vsel %vm544_vm12, %v543_v48, %v541_v49  ;;  %611 = vmatpush1.msra.mxu0 %v556_v46 }
  0x98   : > { %612 = vmatprep.subr.mxu0 %v2364_v5  ;;  %v548_v52 = vmul.f32 %v545_v50, %v2484_v47  ;;  %v547_v53 = vmul.f32 %v546_v51, %v2456_v31 }
  0x99   : > { %613 = vmatpush1.msra.mxu0 %v2357_v4  ;;  %v2525_v4 = vsel %vm489_vm0, 1.0, %v2243_v3 }
  0x9a   : > { %v534_v55 = vpop.permute.xlu1 %533  ;;  %614 = vmatprep.subr.mxu0 %v548_v52  ;;  %v532_v56 = vpop.permute.xlu0 %531 }
  0x9b   : > { %v536_v57 = vsel %vm535_vm14, %v532_v56, %v534_v55  ;;  %v537_v58 = vsel %vm535_vm14, %v534_v55, %v532_v56  ;;  %615 = vmatpush1.msra.mxu0 %v547_v53 }
  0x9c   : > { %v539_v59 = vmul.f32 %v536_v57, %v2471_v40  ;;  %v538_v60 = vmul.f32 %v537_v58, %v2500_v54 }
  0x9e   : > { %v525_v62 = vpop.permute.xlu1 %524  ;;  %616 = vmatprep.subr.mxu0 %v539_v59  ;;  %v523_v63 = vpop.permute.xlu0 %522 }
  0x9f   : > { %v528_v0 = vsel %vm526_vm15, %v525_v62, %v523_v63  ;;  %617 = vmatpush1.msra.mxu0 %v538_v60  ;;  %v527_v1 = vsel %vm526_vm15, %v523_v63, %v525_v62 }
  0xa0   : > { %618 = vmatprep.subr.mxu0 %v527_v1  ;;  %v529_v2 = vmul.f32 %v528_v0, %v2512_v61 }
  0xa2   : > { %v516_v5 = vpop.permute.xlu1 %515  ;;  %619 = vmatpush1.msra.mxu0 %v529_v2  ;;  %v514_v6 = vpop.permute.xlu0 %513 }
  0xa3   : > { %v518_v7 = vsel %vm517_vm1, %v514_v6, %v516_v5  ;;  %v519_v8 = vsel %vm517_vm1, %v516_v5, %v514_v6 }
  0xa4   : > { %v521_v11 = vmul.f32 %v518_v7, %v2484_v47  ;;  %v520_v12 = vmul.f32 %v519_v8, %v2525_v4 }
  0xa6   : > { %620 = vmatprep.subr.mxu0 %v521_v11 }
  0xa7   : > { %621 = vmatpush1.msra.mxu0 %v520_v12 }
  0xa8   : > { %2010 = vmatmul.mubr.msk.f32.vlgmr.msra.gmra.mxu0 %vm586_vm2, %v585_v13 }
  0xa9   : > { %811 = vmatprep.mubr.f32.mxu0 %v2243_v3 }
  0xaf   : > { %v665_v14 = vpop.permute.xlu0 %664  ;;  %v673_v16 = vpop.permute.xlu1 %672 }
 0x168   : > { %v656_v15 = vpop.f32.mrf.mxu0 }
 0x169   : > { %v667_v17 = vmul.f32 %v665_v14, %v656_v15 }
 0x16a   : > { %v658_v18 = vpop.f32.mrf.mxu0 }
 0x16b   : > { %v675_v21 = vadd.f32 %v673_v16, %v667_v17  ;;  %v668_v22 = vmul.f32 %v665_v14, %v658_v18 }
 0x16d   : > { %v2538_v23 = vmax.f32 %v675_v21, 0.0  ;;  %v676_v24 = vadd.f32 %v673_v16, %v668_v22  ;;  %v743_v16 = vld [vmem:[%s3306_s4] sm:$0xff] }
 0x16f   : > { %v678_v25 = vmax.f32 %v676_v24, 0.0  ;;  %735 = vrot.lane.b32.xlu1 %v2538_v23, %s2245_s23  ;;  %v920_v24 = vld [vmem:[%s3311_s9] sm:$0x1] }
 0x171   : > { %737 = vrot.lane.b32.xlu0 %v678_v25, %s2245_s23  ;;  %s473_s23 = scalar_lea.vmem %s3314_s14, %s2017_s10 }
 0x173   : > { %727 = vrot.lane.b32.xlu1 %v2538_v23, %s2244_s22 }
 0x175   : > { %729 = vrot.lane.b32.xlu0 %v678_v25, %s2244_s22 }
 0x177   : > { %719 = vrot.lane.b32.xlu1 %v2538_v23, %s2246_s24 }
 0x179   : > { %721 = vrot.lane.b32.xlu0 %v678_v25, %s2246_s24 }
 0x17b   : > { %711 = vrot.lane.b32.xlu1 %v2538_v23, %s2247_s25 }
 0x17d   : > { %713 = vrot.lane.b32.xlu0 %v678_v25, %s2247_s25 }
 0x17f   : > { %703 = vrot.lane.b32.xlu1 %v2538_v23, %s2248_s26 }
 0x181   : > { %705 = vrot.lane.b32.xlu0 %v678_v25, %s2248_s26 }
 0x183   : > { %695 = vrot.lane.b32.xlu1 %v2538_v23, %s2249_s27 }
 0x185   : > { %697 = vrot.lane.b32.xlu0 %v678_v25, %s2249_s27 }
 0x187   : > { %687 = vrot.lane.b32.xlu1 %v2538_v23, %s2251_s28 }
 0x189   : > { %689 = vrot.lane.b32.xlu0 %v678_v25, %s2251_s28 }
 0x18b   : > { %679 = vrot.lane.b32.xlu1 %v2538_v23, %s2252_s29 }
 0x18d   : > { %681 = vrot.lane.b32.xlu0 %v678_v25, %s2252_s29 }
 0x18f   : > { %821 = vperm.xlu1 %2040, %v818_v26  }
 0x191   : > { %829 = vperm.xlu0 %2039, %v826_v28  }
 0x193   : > { %838 = vperm.xlu1 %2040, %v835_v29  }
 0x197   : > { %924 = vperm.xlu1 %2040, %v921_v32  }
 0x1e1   : > { %v736_v33 = vpop.permute.xlu1 %735 }
 0x1e3   : > { %v738_v34 = vpop.permute.xlu0 %737 }
 0x1e4   : > { %v739_v35 = vsel %vm580_vm6, %v736_v33, %v738_v34  ;;  %v740_v36 = vsel %vm580_vm6, %v738_v34, %v736_v33 }
 0x1e5   : > { %v741_v37 = vmul.f32 %v739_v35, %v2428_v20  ;;  %v728_v38 = vpop.permute.xlu1 %727  ;;  %v742_v39 = vmul.f32 %v740_v36, %v2423_v19 }
 0x1e7   : > { %v730_v41 = vpop.permute.xlu0 %729  ;;  %761 = vmatprep.subr.mxu0 %v742_v39 }
 0x1e8   : > { %v732_v42 = vsel %vm571_vm5, %v730_v41, %v728_v38  ;;  %762 = vmatpush1.msra.mxu0 %v741_v37  ;;  %v731_v46 = vsel %vm571_vm5, %v728_v38, %v730_v41 }
 0x1e9   : > { %v720_v43 = vpop.permute.xlu1 %719  ;;  %v734_v44 = vmul.f32 %v732_v42, %v2445_v27 }
 0x1eb   : > { %v722_v45 = vpop.permute.xlu0 %721  ;;  %763 = vmatprep.subr.mxu0 %v734_v44 }
 0x1ec   : > { %v723_v48 = vsel %vm562_vm9, %v720_v43, %v722_v45  ;;  %v724_v19 = vsel %vm562_vm9, %v722_v45, %v720_v43  ;;  %764 = vmatpush1.msra.mxu0 %v731_v46 }
 0x1ed   : > { %v725_v49 = vmul.f32 %v723_v48, %v2456_v31  ;;  %v712_v50 = vpop.permute.xlu1 %711  ;;  %v726_v51 = vmul.f32 %v724_v19, %v2451_v30 }
 0x1ef   : > { %v714_v52 = vpop.permute.xlu0 %713  ;;  %765 = vmatprep.subr.mxu0 %v726_v51 }
 0x1f0   : > { %v715_v27 = vsel %vm553_vm10, %v712_v50, %v714_v52  ;;  %v716_v53 = vsel %vm553_vm10, %v714_v52, %v712_v50  ;;  %766 = vmatpush1.msra.mxu0 %v725_v49 }
 0x1f1   : > { %v717_v55 = vmul.f32 %v715_v27, %v2428_v20  ;;  %v704_v56 = vpop.permute.xlu1 %703  ;;  %v718_v57 = vmul.f32 %v716_v53, %v2471_v40 }
 0x1f3   : > { %v706_v58 = vpop.permute.xlu0 %705  ;;  %767 = vmatprep.subr.mxu0 %v718_v57 }
 0x1f4   : > { %v707_v59 = vsel %vm544_vm12, %v704_v56, %v706_v58  ;;  %v708_v30 = vsel %vm544_vm12, %v706_v58, %v704_v56  ;;  %768 = vmatpush1.msra.mxu0 %v717_v55 }
 0x1f5   : > { %v709_v60 = vmul.f32 %v708_v30, %v2456_v31  ;;  %769 = vmatprep.subr.mxu0 %v678_v25  ;;  %v696_v62 = vpop.permute.xlu1 %695  ;;  %v710_v63 = vmul.f32 %v707_v59, %v2484_v47  ;;  %v842_v25 = vshrl.u32 %v476_v9, 7 }
 0x1f6   : > { %770 = vmatpush1.msra.mxu0 %v2538_v23 }
 0x1f7   : > { %v698_v20 = vpop.permute.xlu0 %697  ;;  %771 = vmatprep.subr.mxu0 %v710_v63  ;;  %v2643_v26 = vsub.s32 0, %v842_v25 }
 0x1f8   : > { %v699_v0 = vsel %vm535_vm14, %v696_v62, %v698_v20  ;;  %v700_v1 = vsel %vm535_vm14, %v698_v20, %v696_v62  ;;  %772 = vmatpush1.msra.mxu0 %v709_v60 }
 0x1f9   : > { %v701_v2 = vmul.f32 %v700_v1, %v2500_v54  ;;  %v688_v5 = vpop.permute.xlu1 %687  ;;  %v702_v31 = vmul.f32 %v699_v0, %v2471_v40 }
 0x1fb   : > { %v690_v6 = vpop.permute.xlu0 %689  ;;  %773 = vmatprep.subr.mxu0 %v702_v31 }
 0x1fc   : > { %v692_v7 = vsel %vm526_vm15, %v690_v6, %v688_v5  ;;  %774 = vmatpush1.msra.mxu0 %v701_v2  ;;  %v691_v8 = vsel %vm526_vm15, %v688_v5, %v690_v6 }
 0x1fd   : > { %v693_v11 = vmul.f32 %v692_v7, %v2512_v61  ;;  %775 = vmatprep.subr.mxu0 %v691_v8  ;;  %v680_v12 = vpop.permute.xlu1 %679 }
 0x1ff   : > { %v682_v13 = vpop.permute.xlu0 %681  ;;  %776 = vmatpush1.msra.mxu0 %v693_v11 }
 0x200   : > { %v683_v54 = vsel %vm517_vm1, %v680_v12, %v682_v13  ;;  %v684_v40 = vsel %vm517_vm1, %v682_v13, %v680_v12 }
 0x201   : > { %v685_v14 = vmul.f32 %v684_v40, %v2525_v4  ;;  %v686_v15 = vmul.f32 %v683_v54, %v2484_v47  ;;  %v834_v47 = vld [vmem:[%s3309_s7] sm:$0x1] }
 0x203   : > { %777 = vmatprep.subr.mxu0 %v686_v15 }
 0x204   : > { %778 = vmatpush1.msra.mxu0 %v685_v14 }
 0x205   : > { %2011 = vmatmul.mubr.msk.f32.vlgmr.msra.gmra.mxu0 %vm586_vm2, %v743_v16 }
 0x206   : > { %913 = vmatprep.mubr.f32.mxu0 %v2243_v3 }
 0x20a   : > { %v822_v17 = vpop.permute.xlu1 %821 }
 0x20c   : > { %v830_v22 = vpop.permute.xlu0 %829 }
 0x20e   : > { %v839_v28 = vpop.permute.xlu1 %838 }
 0x20f   : > { %v844_v29 = vrot.slane %v839_v28, %v2643_v26 }
 0x212   : > { %v925_v36 = vpop.permute.xlu1 %924 }
 0x213   : > { %v930_v6 = vrot.slane %v925_v36, %v2643_v26 }
 0x2c5   : > { %v813_v61 = vpop.f32.mrf.mxu0 }
 0x2c6   : > { %v824_v18 = vmul.f32 %v822_v17, %v813_v61 }
 0x2c7   : > { %v815_v21 = vpop.f32.mrf.mxu0 }
 0x2c8   : > { %v825_v10 = vmul.f32 %v822_v17, %v815_v21  ;;  %v2624_v4 = vadd.f32 %v830_v22, %v824_v18 }
 0x2ca   : > { %v2622_v23 = vadd.f32 %v830_v22, %v825_v10  ;;  %3356 = vst [vmem:[#allocation6_spill] sm:$0xff] %v2624_v4 }
 0x2cc   : > { %3355 = vst [vmem:[#allocation5_spill] sm:$0xff] %v2622_v23  ;;  %879 = vmatprep.subr.mxu0 %v2622_v23 }
 0x2cd   : > { %880 = vmatpush1.msra.mxu0 %v2624_v4 }
 0x2ce   : > { %2012 = vmatmul.mubr.msk.f32.vlgmr.msra.gmra.mxu0 %vm845_vm3, %v834_v47  ;;  %964 = vmatprep.subr.mxu0 %v2622_v23 }
 0x2cf   : > { %965 = vmatpush1.msra.mxu0 %v2624_v4  ;;  %998 = vmatprep.mubr.f32.mxu0 %v2243_v3 }
 0x2d0   : > { %1045 = vmatprep.subr.mxu0 %v2622_v23 }
 0x2d2   : > { %2013 = vmatmul.mubr.msk.f32.vlgmr.msra.gmra.mxu0 %vm845_vm3, %v920_v24 }
 0x2d3   : > { %1046 = vmatpush1.msra.mxu0 %v2624_v4  ;;  %1079 = vmatprep.mubr.f32.mxu0 %v2243_v3 }
 0x38e   : > { %v915_v32 = vpop.f32.mrf.mxu0 }
 0x38f   : > { %v916_v33 = vadd.f32 %v915_v32, %v844_v29 }
 0x390   : > { %v917_v34 = vpop.f32.mrf.mxu0 }
 0x391   : > { %v918_v35 = vadd.f32 %v917_v34, %v844_v29  ;;  %1086 = vxpose.xlu0.b32.start.end [1/1] (short) %v916_v33, 128 }
 0x392   : > { %v1000_v5 = vpop.f32.mrf.mxu0 }
 0x393   : > { %1118 = vxpose.xlu1.b32.start.end [1/1] (short) %v918_v35, 128  ;;  %v1001_v7 = vadd.f32 %v1000_v5, %v930_v6 }
 0x394   : > { %v1002_v31 = vpop.f32.mrf.mxu0 }
 0x395   : > { %v1003_v8 = vadd.f32 %v1002_v31, %v930_v6  ;;  %v2662_v12 = vrot.slane %v1001_v7, %v2643_v26 }
 0x397   : > { %v2665_v13 = vrot.slane %v1003_v8, %v2643_v26 }
 0x40d   : > { %v1102_v37 = vpop.trf.xlu0 }
 0x40f   : > { %v2646_v38 = vpop.trf.xlu1 }
 0x411   : > { %v1103_v39 = vpop.trf.xlu0 }
 0x412   : > { %1157 = vperm.xlu1 %2040, %v1103_v39  }
 0x413   : > { %v2648_v3 = vpop.trf.xlu1 }
 0x415   : > { %v1104_v9 = vpop.trf.xlu0 }
 0x416   : > { %1162 = vperm.xlu0 %2039, %v1104_v9  }
 0x417   : > { %v2650_v41 = vpop.trf.xlu1 }
 0x419   : > { %v1105_v42 = vpop.trf.xlu0 }
 0x41a   : > { %1167 = vperm.xlu1 %2040, %v1105_v42  }
 0x41b   : > { %v2652_v43 = vpop.trf.xlu1 }
 0x41d   : > { %v1106_v44 = vpop.trf.xlu0 }
 0x41e   : > { %1172 = vperm.xlu0 %2039, %v1106_v44  }
 0x41f   : > { %v2654_v45 = vpop.trf.xlu1 }
 0x421   : > { %v1107_v46 = vpop.trf.xlu0 }
 0x422   : > { %1177 = vperm.xlu1 %2040, %v1107_v46  }
 0x423   : > { %v1139_v48 = vpop.trf.xlu1 }
 0x425   : > { %v1108_v19 = vpop.trf.xlu0 }
 0x426   : > { %1182 = vperm.xlu0 %2039, %v1108_v19  }
 0x427   : > { %v2656_v49 = vpop.trf.xlu1 }
 0x429   : > { %v1109_v50 = vpop.trf.xlu0 }
 0x42a   : > { %1187 = vperm.xlu1 %2040, %v1109_v50  }
 0x42b   : > { %v1141_v51 = vpop.trf.xlu1 }
 0x42d   : > { %v1110_v52 = vpop.trf.xlu0 }
 0x42e   : > { %1192 = vperm.xlu0 %2039, %v1110_v52  }
 0x42f   : > { %v1142_v27 = vpop.trf.xlu1 }
 0x431   : > { %v1111_v53 = vpop.trf.xlu0 }
 0x432   : > { %1197 = vperm.xlu1 %2040, %v1111_v53  }
 0x433   : > { %v1143_v55 = vpop.trf.xlu1 }
 0x435   : > { %v1112_v56 = vpop.trf.xlu0 }
 0x436   : > { %1202 = vperm.xlu0 %2039, %v1112_v56  }
 0x437   : > { %v1144_v57 = vpop.trf.xlu1 }
 0x439   : > { %v1113_v58 = vpop.trf.xlu0 }
 0x43a   : > { %1207 = vperm.xlu0 %2039, %v1113_v58  }
 0x43b   : > { %v1145_v59 = vpop.trf.xlu1 }
 0x43d   : > { %v1114_v30 = vpop.trf.xlu0 }
 0x43e   : > { %1212 = vperm.xlu0 %2039, %v1114_v30  }
 0x43f   : > { %v1146_v60 = vpop.trf.xlu1 }
 0x441   : > { %v1115_v62 = vpop.trf.xlu0 }
 0x442   : > { %1217 = vperm.xlu1 %2040, %v1115_v62  }
 0x443   : > { %v1147_v63 = vpop.trf.xlu1 }
 0x445   : > { %v1116_v20 = vpop.trf.xlu0 }
 0x446   : > { %1222 = vperm.xlu0 %2039, %v1116_v20  }
 0x447   : > { %v1148_v0 = vpop.trf.xlu1 }
 0x448   : > { %1302 = vperm.xlu1 %2040, %v1148_v0  }
 0x449   : > { %v1117_v1 = vpop.trf.xlu0 }
 0x44a   : > { %1152 = vperm.xlu0 %2039, %v1102_v37  }
 0x44b   : > { %v1149_v2 = vpop.trf.xlu1 }
 0x44c   : > { %1227 = vperm.xlu1 %2040, %v1117_v1  }
 0x44e   : > { %1297 = vperm.xlu0 %2039, %v1147_v63  }
 0x450   : > { %1292 = vperm.xlu1 %2040, %v1146_v60  }
 0x452   : > { %1282 = vperm.xlu0 %2039, %v1144_v57  }
 0x454   : > { %1287 = vperm.xlu1 %2040, %v1145_v59  }
 0x456   : > { %1267 = vperm.xlu0 %2039, %v1141_v51  }
 0x458   : > { %1277 = vperm.xlu1 %2040, %v1143_v55  }
 0x45a   : > { %1257 = vperm.xlu0 %2039, %v1139_v48  }
 0x45c   : > { %1272 = vperm.xlu1 %2040, %v1142_v27  }
 0x460   : > { %1307 = vperm.xlu1 %2040, %v1149_v2  }
 0x48d   : > { %v2659_v11 = vpop.permute.xlu1 %1157 }
 0x491   : > { %v1163_v54 = vpop.permute.xlu0 %1162 }
 0x492   : > { %v2762_v31 = vmul.f32 %v2662_v12, %v1163_v54  ;;  %v2765_v6 = vmul.f32 %v2665_v13, %v1163_v54 }
 0x495   : > { %v1168_v40 = vpop.permute.xlu1 %1167 }
 0x496   : > { %v2668_v14 = vmul.f32 %v2662_v12, %v1168_v40  ;;  %v2671_v15 = vmul.f32 %v2665_v13, %v1168_v40 }
 0x498   : > { %v1391_v16 = vmax.f32 %v2668_v14, %v2671_v15 }
 0x499   : > { %v1173_v61 = vpop.permute.xlu0 %1172 }
 0x49a   : > { %v2676_v17 = vmul.f32 %v2662_v12, %v1173_v61  ;;  %v2679_v18 = vmul.f32 %v2665_v13, %v1173_v61  ;;  %1392 = vmax.xlane.f32.xlu0 %v1391_v16  ;;  %v1388_v61 = vmax.f32 %v2762_v31, %v2765_v6 }
 0x49c   : > { %v1394_v21 = vmax.f32 %v2676_v17, %v2679_v18 }
 0x49d   : > { %v1178_v10 = vpop.permute.xlu1 %1177 }
 0x49e   : > { %v2684_v22 = vmul.f32 %v2662_v12, %v1178_v10  ;;  %v2687_v47 = vmul.f32 %v2665_v13, %v1178_v10  ;;  %1395 = vmax.xlane.f32.xlu1 %v1394_v21 }
 0x4a0   : > { %v1397_v24 = vmax.f32 %v2684_v22, %v2687_v47 }
 0x4a1   : > { %v1183_v25 = vpop.permute.xlu0 %1182 }
 0x4a2   : > { %v2692_v26 = vmul.f32 %v2662_v12, %v1183_v25  ;;  %v2695_v28 = vmul.f32 %v2665_v13, %v1183_v25  ;;  %1398 = vmax.xlane.f32.xlu0 %v1397_v24 }
 0x4a4   : > { %v1400_v29 = vmax.f32 %v2692_v26, %v2695_v28 }
 0x4a5   : > { %v1188_v32 = vpop.permute.xlu1 %1187 }
 0x4a6   : > { %v2700_v33 = vmul.f32 %v2662_v12, %v1188_v32  ;;  %v2703_v34 = vmul.f32 %v2665_v13, %v1188_v32  ;;  %1401 = vmax.xlane.f32.xlu1 %v1400_v29  ;;  %v2787_v29 = vmul.f32 %v2662_v12, %v2659_v11 }
 0x4a8   : > { %v1403_v35 = vmax.f32 %v2700_v33, %v2703_v34 }
 0x4a9   : > { %v1193_v36 = vpop.permute.xlu0 %1192 }
 0x4aa   : > { %v2708_v37 = vmul.f32 %v2662_v12, %v1193_v36  ;;  %v2711_v39 = vmul.f32 %v2665_v13, %v1193_v36  ;;  %1404 = vmax.xlane.f32.xlu0 %v1403_v35 }
 0x4ac   : > { %v1406_v9 = vmax.f32 %v2708_v37, %v2711_v39 }
 0x4ad   : > { %v1198_v42 = vpop.permute.xlu1 %1197 }
 0x4ae   : > { %v2716_v44 = vmul.f32 %v2662_v12, %v1198_v42  ;;  %v2719_v46 = vmul.f32 %v2665_v13, %v1198_v42  ;;  %1407 = vmax.xlane.f32.xlu1 %v1406_v9 }
 0x4b0   : > { %v1409_v48 = vmax.f32 %v2716_v44, %v2719_v46 }
 0x4b1   : > { %v1203_v19 = vpop.permute.xlu0 %1202 }
 0x4b2   : > { %v2724_v50 = vmul.f32 %v2662_v12, %v1203_v19  ;;  %v2727_v51 = vmul.f32 %v2665_v13, %v1203_v19  ;;  %1410 = vmax.xlane.f32.xlu0 %v1409_v48 }
 0x4b4   : > { %v1412_v52 = vmax.f32 %v2724_v50, %v2727_v51 }
 0x4b5   : > { %v1208_v27 = vpop.permute.xlu0 %1207 }
 0x4b6   : > { %v2732_v53 = vmul.f32 %v2662_v12, %v1208_v27  ;;  %v2735_v55 = vmul.f32 %v2665_v13, %v1208_v27  ;;  %1413 = vmax.xlane.f32.xlu1 %v1412_v52 }
 0x4b8   : > { %v1415_v56 = vmax.f32 %v2732_v53, %v2735_v55 }
 0x4b9   : > { %v1213_v57 = vpop.permute.xlu0 %1212 }
 0x4ba   : > { %v2740_v58 = vmul.f32 %v2662_v12, %v1213_v57  ;;  %v2743_v59 = vmul.f32 %v2665_v13, %v1213_v57  ;;  %1416 = vmax.xlane.f32.xlu1 %v1415_v56 }
 0x4bc   : > { %v1418_v30 = vmax.f32 %v2740_v58, %v2743_v59 }
 0x4bd   : > { %v1218_v60 = vpop.permute.xlu1 %1217 }
 0x4be   : > { %v2748_v62 = vmul.f32 %v2662_v12, %v1218_v60  ;;  %v2751_v63 = vmul.f32 %v2665_v13, %v1218_v60  ;;  %1419 = vmax.xlane.f32.xlu0 %v1418_v30 }
 0x4c0   : > { %v1421_v20 = vmax.f32 %v2748_v62, %v2751_v63 }
 0x4c1   : > { %v1223_v0 = vpop.permute.xlu0 %1222 }
 0x4c2   : > { %v2756_v1 = vmul.f32 %v2662_v12, %v1223_v0  ;;  %v2759_v2 = vmul.f32 %v2665_v13, %v1223_v0  ;;  %1422 = vmax.xlane.f32.xlu1 %v1421_v20 }
 0x4c3   : > { %v1303_v5 = vpop.permute.xlu1 %1302 }
 0x4c4   : > { %v1424_v7 = vmax.f32 %v2756_v1, %v2759_v2  ;;  %v2811_v36 = vmul.f32 %v2665_v13, %v1303_v5 }
 0x4c6   : > { %1425 = vmax.xlane.f32.xlu1 %v1424_v7  ;;  %3357 = vst [vmem:[#allocation7_spill] sm:$0xff] %v2811_v36 }
 0x4c7   : > { %v1228_v8 = vpop.permute.xlu1 %1227 }
 0x4c8   : > { %v2770_v40 = vmul.f32 %v2662_v12, %v1228_v8  ;;  %v2773_v16 = vmul.f32 %v2665_v13, %v1228_v8 }
 0x4ca   : > { %v1427_v21 = vmax.f32 %v2770_v40, %v2773_v16  ;;  %1389 = vmax.xlane.f32.xlu1 %v1388_v61 }
 0x4cb   : > { %v1293_v54 = vpop.permute.xlu1 %1292 }
 0x4cc   : > { %1428 = vmax.xlane.f32.xlu0 %v1427_v21  ;;  %v2828_v57 = vmul.f32 %v2662_v12, %v1293_v54  ;;  %v2831_v30 = vmul.f32 %v2665_v13, %v1293_v54 }
 0x4ce   : > { %3360 = vst [vmem:[#allocation10_spill] sm:$0xff] %v2828_v57  ;;  %3361 = vst [vmem:[#allocation11_spill] sm:$0xff] %v2831_v30  ;;  %v1466_v60 = vmax.f32 %v2828_v57, %v2831_v30 }
 0x4cf   : > { %v1288_v10 = vpop.permute.xlu1 %1287 }
 0x4d0   : > { %v2836_v20 = vmul.f32 %v2662_v12, %v1288_v10  ;;  %v2839_v0 = vmul.f32 %v2665_v13, %v1288_v10 }
 0x4d2   : > { %3362 = vst [vmem:[#allocation12_spill] sm:$0xff] %v2836_v20  ;;  %3363 = vst [vmem:[#allocation13_spill] sm:$0xff] %v2839_v0  ;;  %v1463_v61 = vmax.f32 %v2836_v20, %v2839_v0 }
 0x4d3   : > { %v1278_v24 = vpop.permute.xlu1 %1277 }
 0x4d4   : > { %v2852_v54 = vmul.f32 %v2662_v12, %v1278_v24  ;;  %v2855_v10 = vmul.f32 %v2665_v13, %v1278_v24 }
 0x4d6   : > { %3366 = vst [vmem:[#allocation16_spill] sm:$0xff] %v2852_v54  ;;  %3367 = vst [vmem:[#allocation17_spill] sm:$0xff] %v2855_v10 }
 0x4d7   : > { %v1273_v25 = vpop.permute.xlu1 %1272 }
 0x4db   : > { %1262 = vperm.xlu1 %2040, %v2656_v49   ;;  %v2791_v49 = vmul.f32 %v2665_v13, %v2659_v11  ;;  %v2808_v11 = vmul.f32 %v2662_v12, %v1303_v5 }
 0x4dd   : > { %v1472_v19 = vmax.f32 %v2808_v11, %v2811_v36 }
 0x4df   : > { %1252 = vperm.xlu1 %2040, %v2654_v45   ;;  %v1308_v45 = vpop.permute.xlu1 %1307 }
 0x4e2   : > { %1247 = vperm.xlu0 %2039, %v2652_v43   ;;  %v1153_v43 = vpop.permute.xlu0 %1152 }
 0x4e3   : > { %1242 = vperm.xlu1 %2040, %v2650_v41   ;;  %v1385_v41 = vmax.f32 %v2787_v29, %v2791_v49  ;;  %v2802_v32 = vmul.f32 %v2662_v12, %v1153_v43  ;;  %v2805_v35 = vmul.f32 %v2665_v13, %v1153_v43  ;;  %v2860_v43 = vmul.f32 %v2662_v12, %v1273_v25 }
 0x4e5   : > { %v1382_v48 = vmax.f32 %v2802_v32, %v2805_v35  ;;  %3368 = vst [vmem:[#allocation18_spill] sm:$0xff] %v2860_v43 }
 0x4e6   : > { %1237 = vperm.xlu0 %2039, %v2648_v3   ;;  %v2796_v3 = vmul.f32 %v2662_v12, %v1308_v45  ;;  %v1298_v42 = vpop.permute.xlu0 %1297 }
 0x4e7   : > { %1232 = vperm.xlu1 %2040, %v2646_v38   ;;  %v2799_v38 = vmul.f32 %v2665_v13, %v1308_v45  ;;  %v2820_v52 = vmul.f32 %v2662_v12, %v1298_v42  ;;  %v2823_v27 = vmul.f32 %v2665_v13, %v1298_v42  ;;  %v1457_v45 = vmax.f32 %v2852_v54, %v2855_v10 }
 0x4e9   : > { %v1475_v9 = vmax.f32 %v2796_v3, %v2799_v38  ;;  %3358 = vst [vmem:[#allocation8_spill] sm:$0xff] %v2820_v52  ;;  %3359 = vst [vmem:[#allocation9_spill] sm:$0xff] %v2823_v27  ;;  %v1469_v56 = vmax.f32 %v2820_v52, %v2823_v27 }
 0x4ea   : > { %v1283_v5 = vpop.permute.xlu0 %1282 }
 0x4eb   : > { %v2842_v7 = vmul.f32 %v2662_v12, %v1283_v5  ;;  %v2845_v8 = vmul.f32 %v2665_v13, %v1283_v5 }
 0x4ed   : > { %3364 = vst [vmem:[#allocation14_spill] sm:$0xff] %v2842_v7  ;;  %3365 = vst [vmem:[#allocation15_spill] sm:$0xff] %v2845_v8  ;;  %v1460_v21 = vmax.f32 %v2842_v7, %v2845_v8 }
 0x505   : > { %1386 = vmax.xlane.f32.xlu0 %v1385_v41  ;;  %v2863_v41 = vmul.f32 %v2665_v13, %v1273_v25 }
 0x507   : > { %3369 = vst [vmem:[#allocation19_spill] sm:$0xff] %v2863_v41  ;;  %v1454_v24 = vmax.f32 %v2860_v43, %v2863_v41 }
 0x509   : > { %1476 = vmax.xlane.f32.xlu0 %v1475_v9  ;;  %v1268_v9 = vpop.permute.xlu0 %1267 }
 0x50a   : > { %v2866_v42 = vmul.f32 %v2662_v12, %v1268_v9 }
 0x50b   : > { %1383 = vmax.xlane.f32.xlu1 %v1382_v48  ;;  %v2869_v48 = vmul.f32 %v2665_v13, %v1268_v9 }
 0x50c   : > { %3370 = vst [vmem:[#allocation20_spill] sm:$0xff] %v2866_v42 }
 0x50d   : > { %1473 = vmax.xlane.f32.xlu0 %v1472_v19  ;;  %3371 = vst [vmem:[#allocation21_spill] sm:$0xff] %v2869_v48  ;;  %v1451_v19 = vmax.f32 %v2866_v42, %v2869_v48 }
 0x511   : > { %1470 = vmax.xlane.f32.xlu0 %v1469_v56 }
 0x515   : > { %1467 = vmax.xlane.f32.xlu0 %v1466_v60  ;;  %v1258_v60 = vpop.permute.xlu0 %1257 }
 0x519   : > { %1464 = vmax.xlane.f32.xlu0 %v1463_v61 }
 0x51d   : > { %1461 = vmax.xlane.f32.xlu0 %v1460_v21 }
 0x521   : > { %1458 = vmax.xlane.f32.xlu0 %v1457_v45 }
 0x523   : > { %v2881_v61 = vpop.xlane.xlu0 %1392 }
 0x525   : > { %1455 = vmax.xlane.f32.xlu0 %v1454_v24  ;;  %v1005_v24 = vld [vmem:[%s3312_s11] sm:$0xff] }
 0x526   : > { %2014 = vmatmul.mubr.msk.f32.vlgmr.msra.gmra.mxu0 %vm845_vm3, %v1005_v24 }
 0x527   : > { %v2875_v56 = vpop.xlane.xlu1 %1395 }
 0x529   : > { %1452 = vmax.xlane.f32.xlu0 %v1451_v19 }
 0x52b   : > { %v1399_v45 = vpop.xlane.xlu0 %1398 }
 0x52f   : > { %v2877_v25 = vpop.xlane.xlu1 %1401 }
 0x533   : > { %v2888_v23 = vpop.xlane.xlu0 %1404 }
 0x537   : > { %v2879_v5 = vpop.xlane.xlu1 %1407 }
 0x53b   : > { %v2891_v4 = vpop.xlane.xlu0 %1410 }
 0x53f   : > { %v2883_v21 = vpop.xlane.xlu1 %1413 }
 0x543   : > { %v1417_v9 = vpop.xlane.xlu1 %1416 }
 0x547   : > { %v1420_v42 = vpop.xlane.xlu0 %1419 }
 0x54b   : > { %v1423_v19 = vpop.xlane.xlu1 %1422 }
 0x54c   : > { %v1504_v0 = vsub.f32 %v2748_v62, %v1423_v19  ;;  %v1505_v52 = vsub.f32 %v2751_v63, %v1423_v19 }
 0x54f   : > { %v1426_v48 = vpop.xlane.xlu1 %1425 }
 0x550   : > { %v1506_v43 = vsub.f32 %v2756_v1, %v1426_v48  ;;  %v1507_v10 = vsub.f32 %v2759_v2, %v1426_v48  ;;  %v2908_v2 = vmul.f32 %v2662_v12, %v1258_v60 }
 0x552   : > { %v1598_v24 = vmul.f32 1.442695, %v1506_v43  ;;  %v1600_v36 = vmul.f32 1.442695, %v1507_v10 }
 0x553   : > { %v2893_v41 = vpop.xlane.xlu1 %1389 }
 0x555   : > { %v1429_v54 = vpop.xlane.xlu0 %1428 }
 0x556   : > { %v1508_v8 = vsub.f32 %v2770_v40, %v1429_v54  ;;  %v1509_v7 = vsub.f32 %v2773_v16, %v1429_v54  ;;  %v2911_v40 = vmul.f32 %v2665_v13, %v1258_v60  ;;  %v1502_v16 = vsub.f32 %v2740_v58, %v1420_v42 }
 0x557   : > { %v1263_v20 = vpop.permute.xlu1 %1262 }
 0x558   : > { %v1602_v30 = vmul.f32 1.442695, %v1508_v8  ;;  %v1604_v57 = vmul.f32 1.442695, %v1509_v7  ;;  %v2901_v27 = vmul.f32 %v2662_v12, %v1263_v20  ;;  %v2905_v1 = vmul.f32 %v2665_v13, %v1263_v20 }
 0x559   : > { %v1594_v7 = vmul.f32 1.442695, %v1504_v0  ;;  %v1503_v8 = vsub.f32 %v2743_v59, %v1420_v42  ;;  %v1596_v20 = vmul.f32 1.442695, %v1505_v52  ;;  %v1445_v54 = vmax.f32 %v2908_v2, %v2911_v40 }
 0x55a   : > { %2041 = vpow2.f32 %v1602_v30  ;;  %v1448_v62 = vmax.f32 %v2901_v27, %v2905_v1  ;;  %v1488_v30 = vsub.f32 %v2684_v22, %v1399_v45  ;;  %v1500_v0 = vsub.f32 %v2732_v53, %v1417_v9 }
 0x55b   : > { %2043 = vpow2.f32 %v1604_v57  ;;  %v1253_v63 = vpop.permute.xlu1 %1252  ;;  %v1489_v57 = vsub.f32 %v2687_v47, %v1399_v45  ;;  %v1590_v43 = vmul.f32 1.442695, %v1502_v16  ;;  %v1592_v52 = vmul.f32 1.442695, %v1503_v8 }
 0x55c   : > { %2045 = vpow2.f32 %v1598_v24  ;;  %1449 = vmax.xlane.f32.xlu0 %v1448_v62  ;;  %v2922_v10 = vmul.f32 %v2662_v12, %v1253_v63  ;;  %v2925_v58 = vmul.f32 %v2665_v13, %v1253_v63  ;;  %v1484_v22 = vsub.f32 %v2668_v14, %v2881_v61 }
 0x55d   : > { %2047 = vpow2.f32 %v1600_v36  ;;  %v1248_v59 = vpop.permute.xlu0 %1247  ;;  %v1501_v36 = vsub.f32 %v2735_v55, %v1417_v9  ;;  %v1485_v47 = vsub.f32 %v2671_v15, %v2881_v61  ;;  %v1562_v42 = vmul.f32 1.442695, %v1488_v30 }
 0x55e   : > { %2049 = vpow2.f32 %v1594_v7  ;;  %v1564_v48 = vmul.f32 1.442695, %v1489_v57  ;;  %v1442_v60 = vmax.f32 %v2922_v10, %v2925_v58  ;;  %v2936_v53 = vmul.f32 %v2662_v12, %v1248_v59 }
 0x55f   : > { %2051 = vpow2.f32 %v1596_v20  ;;  %v2939_v45 = vmul.f32 %v2665_v13, %v1248_v59  ;;  %v1498_v55 = vsub.f32 %v2724_v50, %v2883_v21  ;;  %v1586_v9 = vmul.f32 1.442695, %v1500_v0  ;;  %v1243_v14 = vpop.permute.xlu1 %1242 }
 0x560   : > { %1446 = vmax.xlane.f32.xlu0 %v1445_v54  ;;  %2053 = vpow2.f32 %v1590_v43  ;;  %v1499_v15 = vsub.f32 %v2727_v51, %v2883_v21  ;;  %v1588_v61 = vmul.f32 1.442695, %v1501_v36  ;;  %v1554_v19 = vmul.f32 1.442695, %v1484_v22 }
 0x561   : > { %2055 = vpow2.f32 %v1592_v52  ;;  %v1556_v24 = vmul.f32 1.442695, %v1485_v47  ;;  %v1439_v16 = vmax.f32 %v2936_v53, %v2939_v45  ;;  %v2950_v50 = vmul.f32 %v2662_v12, %v1243_v14  ;;  %v1238_v8 = vpop.permute.xlu0 %1237 }
 0x562   : > { %2057 = vpow2.f32 %v1562_v42  ;;  %v2953_v7 = vmul.f32 %v2665_v13, %v1243_v14  ;;  %v1496_v51 = vsub.f32 %v2716_v44, %v2891_v4  ;;  %v1582_v21 = vmul.f32 1.442695, %v1498_v55 }
 0x563   : > { %2059 = vpow2.f32 %v1564_v48  ;;  %v1497_v30 = vsub.f32 %v2719_v46, %v2891_v4  ;;  %v1584_v54 = vmul.f32 1.442695, %v1499_v15  ;;  %v2970_v43 = vmul.f32 %v2662_v12, %v1238_v8  ;;  %v1233_v36 = vpop.permute.xlu1 %1232 }
 0x564   : > { %1443 = vmax.xlane.f32.xlu0 %v1442_v60  ;;  %2061 = vpow2.f32 %v1586_v9  ;;  %v1436_v44 = vmax.f32 %v2950_v50, %v2953_v7  ;;  %v2973_v59 = vmul.f32 %v2665_v13, %v1238_v8  ;;  %v1494_v4 = vsub.f32 %v2708_v37, %v2879_v5 }
 0x565   : > { %2063 = vpow2.f32 %v1588_v61  ;;  %v1578_v46 = vmul.f32 1.442695, %v1496_v51  ;;  %v1495_v22 = vsub.f32 %v2711_v39, %v2879_v5  ;;  %v1580_v47 = vmul.f32 1.442695, %v1497_v30 }
 0x566   : > { %2065 = vpow2.f32 %v1554_v19  ;;  %v1433_v60 = vmax.f32 %v2970_v43, %v2973_v59  ;;  %v2988_v37 = vmul.f32 %v2662_v12, %v1233_v36  ;;  %v2991_v55 = vmul.f32 %v2665_v13, %v1233_v36 }
 0x567   : > { %v2945_v62 = vpop.eup %2041  ;;  %2067 = vpow2.f32 %v1556_v24  ;;  %v1492_v39 = vsub.f32 %v2700_v33, %v2888_v23  ;;  %v1574_v5 = vmul.f32 1.442695, %v1494_v4  ;;  %v1493_v14 = vsub.f32 %v2703_v34, %v2888_v23 }
 0x568   : > { %v2955_v63 = vpop.eup %2043  ;;  %1440 = vmax.xlane.f32.xlu0 %v1439_v16  ;;  %2069 = vpow2.f32 %v1582_v21  ;;  %v1576_v15 = vmul.f32 1.442695, %v1495_v22  ;;  %v1430_v33 = vmax.f32 %v2988_v37, %v2991_v55  ;;  %v1490_v24 = vsub.f32 %v2692_v26, %v2877_v25 }
 0x569   : > { %v2959_v20 = vpop.eup %2045  ;;  %v1715_v57 = vadd.f32 %v2955_v63, %v2945_v62  ;;  %2071 = vpow2.f32 %v1584_v54  ;;  %v1570_v23 = vmul.f32 1.442695, %v1492_v39  ;;  %v1491_v16 = vsub.f32 %v2695_v28, %v2877_v25 }
 0x56a   : > { %v2965_v0 = vpop.eup %2047  ;;  %2073 = vpow2.f32 %v1578_v46  ;;  %v1572_v51 = vmul.f32 1.442695, %v1493_v14  ;;  %v1566_v28 = vmul.f32 1.442695, %v1490_v24  ;;  %v1482_v22 = vsub.f32 %v2762_v31, %v2893_v41 }
 0x56b   : > { %1716 = vadd.xlane.f32.xlu1 %v1715_v57  ;;  %v2977_v52 = vpop.eup %2049  ;;  %v1712_v42 = vadd.f32 %v2965_v0, %v2959_v20  ;;  %2075 = vpow2.f32 %v1580_v47  ;;  %v1486_v57 = vsub.f32 %v2676_v17, %v2875_v56  ;;  %v1568_v4 = vmul.f32 1.442695, %v1491_v16 }
 0x56c   : > { %1437 = vmax.xlane.f32.xlu0 %v1436_v44  ;;  %v2983_v48 = vpop.eup %2051  ;;  %2077 = vpow2.f32 %v1574_v5  ;;  %v1487_v44 = vsub.f32 %v2679_v18, %v2875_v56  ;;  %v1483_v18 = vsub.f32 %v2765_v6, %v2893_v41  ;;  %v1550_v31 = vmul.f32 1.442695, %v1482_v22 }
 0x56d   : > { %v2995_v9 = vpop.eup %2053  ;;  %v1709_v12 = vadd.f32 %v2983_v48, %v2977_v52  ;;  %2079 = vpow2.f32 %v1576_v15  ;;  %v1558_v47 = vmul.f32 1.442695, %v1486_v57 }
 0x56e   : > { %v3001_v61 = vpop.eup %2055  ;;  %2081 = vpow2.f32 %v1570_v23  ;;  %v1552_v5 = vmul.f32 1.442695, %v1483_v18 }
 0x56f   : > { %1713 = vadd.xlane.f32.xlu1 %v1712_v42  ;;  %v3003_v13 = vpop.eup %2057  ;;  %v1706_v21 = vadd.f32 %v3001_v61, %v2995_v9  ;;  %2083 = vpow2.f32 %v1572_v51  ;;  %v1560_v42 = vmul.f32 1.442695, %v1487_v44 }
 0x570   : > { %1434 = vmax.xlane.f32.xlu0 %v1433_v60  ;;  %v3007_v19 = vpop.eup %2059  ;;  %2085 = vpow2.f32 %v1566_v28 }
 0x571   : > { %v3011_v34 = vpop.eup %2061  ;;  %v1685_v26 = vadd.f32 %v3007_v19, %v3003_v13  ;;  %2087 = vpow2.f32 %v1568_v4 }
 0x572   : > { %v3017_v8 = vpop.eup %2063  ;;  %2089 = vpow2.f32 %v1558_v47 }
 0x573   : > { %1710 = vadd.xlane.f32.xlu1 %v1709_v12  ;;  %v3019_v30 = vpop.eup %2065  ;;  %v1703_v46 = vadd.f32 %v3017_v8, %v3011_v34  ;;  %2091 = vpow2.f32 %v1560_v42 }
 0x574   : > { %1431 = vmax.xlane.f32.xlu0 %v1430_v33  ;;  %v3023_v54 = vpop.eup %2067  ;;  %2093 = vpow2.f32 %v1550_v31 }
 0x575   : > { %v3027_v25 = vpop.eup %2069  ;;  %v1679_v17 = vadd.f32 %v3023_v54, %v3019_v30  ;;  %2095 = vpow2.f32 %v1552_v5 }
 0x576   : > { %v3033_v36 = vpop.eup %2071 }
 0x577   : > { %1707 = vadd.xlane.f32.xlu1 %v1706_v21  ;;  %v3041_v56 = vpop.eup %2073  ;;  %v1700_v60 = vadd.f32 %v3033_v36, %v3027_v25 }
 0x578   : > { %1686 = vadd.xlane.f32.xlu0 %v1685_v26  ;;  %v3045_v39 = vpop.eup %2075 }
 0x579   : > { %v3047_v14 = vpop.eup %2077  ;;  %v1697_v6 = vadd.f32 %v3045_v39, %v3041_v56 }
 0x57a   : > { %v3051_v41 = vpop.eup %2079 }
 0x57b   : > { %1704 = vadd.xlane.f32.xlu1 %v1703_v46  ;;  %v3053_v15 = vpop.eup %2081  ;;  %v1694_v12 = vadd.f32 %v3051_v41, %v3047_v14 }
 0x57c   : > { %1680 = vadd.xlane.f32.xlu0 %v1679_v17  ;;  %v3057_v33 = vpop.eup %2083 }
 0x57d   : > { %v3059_v24 = vpop.eup %2085  ;;  %v1691_v23 = vadd.f32 %v3057_v33, %v3053_v15 }
 0x57e   : > { %v3063_v16 = vpop.eup %2087 }
 0x57f   : > { %1701 = vadd.xlane.f32.xlu1 %v1700_v60  ;;  %v3065_v51 = vpop.eup %2089  ;;  %v1688_v21 = vadd.f32 %v3063_v16, %v3059_v24 }
 0x580   : > { %v3069_v26 = vpop.eup %2091 }
 0x581   : > { %v3073_v4 = vpop.eup %2093  ;;  %v1682_v47 = vadd.f32 %v3069_v26, %v3065_v51 }
 0x582   : > { %v3075_v46 = vpop.eup %2095 }
 0x583   : > { %1698 = vadd.xlane.f32.xlu1 %v1697_v6 }
 0x587   : > { %1695 = vadd.xlane.f32.xlu1 %v1694_v12 }
 0x58b   : > { %1692 = vadd.xlane.f32.xlu1 %v1691_v23 }
 0x58e   : > { %v1387_v57 = vpop.xlane.xlu0 %1386 }
 0x58f   : > { %v1480_v28 = vsub.f32 %v2787_v29, %v1387_v57  ;;  %v1481_v44 = vsub.f32 %v2791_v49, %v1387_v57  ;;  %1689 = vadd.xlane.f32.xlu1 %v1688_v21  ;;  %v1676_v49 = vadd.f32 %v3075_v46, %v3073_v4 }
 0x591   : > { %v1546_v22 = vmul.f32 1.442695, %v1480_v28  ;;  %v1548_v17 = vmul.f32 1.442695, %v1481_v44 }
 0x592   : > { %v1477_v18 = vpop.xlane.xlu0 %1476 }
 0x593   : > { %2097 = vpow2.f32 %v1546_v22  ;;  %v1540_v42 = vsub.f32 %v2796_v3, %v1477_v18  ;;  %v1541_v60 = vsub.f32 %v2799_v38, %v1477_v18  ;;  %1683 = vadd.xlane.f32.xlu1 %v1682_v47  ;;  %v3372_v38 = vld [vmem:[#allocation7_spill] sm:$0xff]  ;;  %v3373_v47 = vld [vmem:[#allocation8_spill] sm:$0xff]  ;;  %v3374_v18 = vld [vmem:[#allocation9_spill] sm:$0xff] }
 0x594   : > { %2099 = vpow2.f32 %v1548_v17  ;;  %v1384_v29 = vpop.xlane.xlu1 %1383 }
 0x595   : > { %v1666_v31 = vmul.f32 1.442695, %v1540_v42  ;;  %v1668_v5 = vmul.f32 1.442695, %v1541_v60  ;;  %v1478_v6 = vsub.f32 %v2802_v32, %v1384_v29  ;;  %v1479_v12 = vsub.f32 %v2805_v35, %v1384_v29 }
 0x596   : > { %v1474_v23 = vpop.xlane.xlu0 %1473 }
 0x597   : > { %2101 = vpow2.f32 %v1666_v31  ;;  %v1542_v21 = vmul.f32 1.442695, %v1478_v6  ;;  %v1544_v57 = vmul.f32 1.442695, %v1479_v12  ;;  %v1538_v3 = vsub.f32 %v2808_v11, %v1474_v23  ;;  %1677 = vadd.xlane.f32.xlu1 %v1676_v49  ;;  %v3375_v11 = vld [vmem:[#allocation10_spill] sm:$0xff]  ;;  %v3376_v31 = vld [vmem:[#allocation11_spill] sm:$0xff] }
 0x598   : > { %2103 = vpow2.f32 %v1668_v5  ;;  %v1539_v28 = vsub.f32 %v3372_v38, %v1474_v23  ;;  %v3377_v38 = vld [vmem:[#allocation12_spill] sm:$0xff] }
 0x599   : > { %2105 = vpow2.f32 %v1542_v21  ;;  %v1662_v44 = vmul.f32 1.442695, %v1538_v3 }
 0x59a   : > { %2107 = vpow2.f32 %v1544_v57  ;;  %v1664_v22 = vmul.f32 1.442695, %v1539_v28  ;;  %v1471_v17 = vpop.xlane.xlu0 %1470 }
 0x59b   : > { %2109 = vpow2.f32 %v1662_v44  ;;  %v1536_v32 = vsub.f32 %v3373_v47, %v1471_v17  ;;  %v1537_v35 = vsub.f32 %v3374_v18, %v1471_v17  ;;  %v3378_v44 = vld [vmem:[#allocation13_spill] sm:$0xff] }
 0x59c   : > { %2111 = vpow2.f32 %v1664_v22 }
 0x59d   : > { %v1658_v42 = vmul.f32 1.442695, %v1536_v32  ;;  %v1660_v60 = vmul.f32 1.442695, %v1537_v35 }
 0x59e   : > { %v1468_v29 = vpop.xlane.xlu0 %1467 }
 0x59f   : > { %2113 = vpow2.f32 %v1658_v42  ;;  %v1534_v49 = vsub.f32 %v3375_v11, %v1468_v29  ;;  %v1535_v5 = vsub.f32 %v3376_v31, %v1468_v29  ;;  %v3380_v11 = vld [vmem:[#allocation14_spill] sm:$0xff]  ;;  %v3381_v31 = vld [vmem:[#allocation15_spill] sm:$0xff] }
 0x5a0   : > { %v3091_v6 = vpop.eup %2097  ;;  %2115 = vpow2.f32 %v1660_v60 }
 0x5a1   : > { %v3093_v12 = vpop.eup %2099  ;;  %v1654_v23 = vmul.f32 1.442695, %v1534_v49  ;;  %v1656_v21 = vmul.f32 1.442695, %v1535_v5 }
 0x5a2   : > { %v1465_v57 = vpop.xlane.xlu0 %1464  ;;  %v1673_v3 = vadd.f32 %v3093_v12, %v3091_v6 }
 0x5a3   : > { %2117 = vpow2.f32 %v1654_v23  ;;  %v1532_v28 = vsub.f32 %v3377_v38, %v1465_v57  ;;  %v1533_v22 = vsub.f32 %v3378_v44, %v1465_v57  ;;  %v3384_v44 = vld [vmem:[#allocation16_spill] sm:$0xff] }
 0x5a4   : > { %v3099_v17 = vpop.eup %2101  ;;  %2119 = vpow2.f32 %v1656_v21  ;;  %1674 = vadd.xlane.f32.xlu0 %v1673_v3 }
 0x5a5   : > { %3379 = vst [vmem:[#allocation7_spill] sm:$0xff] %v3099_v17  ;;  %v3101_v47 = vpop.eup %2103  ;;  %v1650_v32 = vmul.f32 1.442695, %v1532_v28  ;;  %v1652_v18 = vmul.f32 1.442695, %v1533_v22 }
 0x5a6   : > { %v3103_v35 = vpop.eup %2105  ;;  %v1462_v42 = vpop.xlane.xlu0 %1461  ;;  %v1763_v60 = vadd.f32 %v3101_v47, %v3099_v17 }
 0x5a7   : > { %v3107_v29 = vpop.eup %2107  ;;  %2121 = vpow2.f32 %v1650_v32  ;;  %v1530_v49 = vsub.f32 %v3380_v11, %v1462_v42  ;;  %v1531_v5 = vsub.f32 %v3381_v31, %v1462_v42  ;;  %v3385_v32 = vld [vmem:[#allocation17_spill] sm:$0xff] }
 0x5a8   : > { %v3111_v23 = vpop.eup %2109  ;;  %2123 = vpow2.f32 %v1652_v18  ;;  %1764 = vadd.xlane.f32.xlu0 %v1763_v60  ;;  %v1670_v21 = vadd.f32 %v3107_v29, %v3103_v35 }
 0x5a9   : > { %3382 = vst [vmem:[#allocation8_spill] sm:$0xff] %v3111_v23  ;;  %v3115_v57 = vpop.eup %2111  ;;  %v1646_v3 = vmul.f32 1.442695, %v1530_v49  ;;  %v1648_v38 = vmul.f32 1.442695, %v1531_v5 }
 0x5aa   : > { %3383 = vst [vmem:[#allocation9_spill] sm:$0xff] %v3115_v57  ;;  %1671 = vadd.xlane.f32.xlu1 %v1670_v21  ;;  %v1459_v28 = vpop.xlane.xlu0 %1458  ;;  %v1760_v18 = vadd.f32 %v3115_v57, %v3111_v23  ;;  %v3388_v21 = vld [vmem:[#allocation18_spill] sm:$0xff] }
 0x5ab   : > { %2125 = vpow2.f32 %v1646_v3  ;;  %v1528_v22 = vsub.f32 %v3384_v44, %v1459_v28  ;;  %v1529_v11 = vsub.f32 %v3385_v32, %v1459_v28  ;;  %v3389_v44 = vld [vmem:[#allocation19_spill] sm:$0xff] }
 0x5ac   : > { %v3119_v17 = vpop.eup %2113  ;;  %2127 = vpow2.f32 %v1648_v38 }
 0x5ad   : > { %3386 = vst [vmem:[#allocation10_spill] sm:$0xff] %v3119_v17  ;;  %v3123_v42 = vpop.eup %2115  ;;  %v1642_v60 = vmul.f32 1.442695, %v1528_v22  ;;  %v1644_v31 = vmul.f32 1.442695, %v1529_v11 }
 0x5ae   : > { %3387 = vst [vmem:[#allocation11_spill] sm:$0xff] %v3123_v42  ;;  %1761 = vadd.xlane.f32.xlu1 %v1760_v18  ;;  %v1456_v49 = vpop.xlane.xlu0 %1455  ;;  %v1757_v5 = vadd.f32 %v3123_v42, %v3119_v17  ;;  %v3390_v18 = vld [vmem:[#allocation20_spill] sm:$0xff] }
 0x5af   : > { %2129 = vpow2.f32 %v1642_v60  ;;  %v1526_v3 = vsub.f32 %v3388_v21, %v1456_v49  ;;  %v1527_v28 = vsub.f32 %v3389_v44, %v1456_v49  ;;  %v3391_v60 = vld [vmem:[#allocation21_spill] sm:$0xff] }
 0x5b0   : > { %v3129_v32 = vpop.eup %2117  ;;  %2131 = vpow2.f32 %v1644_v31  ;;  %1758 = vadd.xlane.f32.xlu0 %v1757_v5 }
 0x5b1   : > { %v3131_v38 = vpop.eup %2119  ;;  %v1638_v23 = vmul.f32 1.442695, %v1526_v3  ;;  %v1640_v57 = vmul.f32 1.442695, %v1527_v28 }
 0x5b2   : > { %v1453_v22 = vpop.xlane.xlu0 %1452  ;;  %v1754_v11 = vadd.f32 %v3131_v38, %v3129_v32 }
 0x5b3   : > { %2133 = vpow2.f32 %v1638_v23  ;;  %v1524_v17 = vsub.f32 %v3390_v18, %v1453_v22  ;;  %v1525_v42 = vsub.f32 %v3391_v60, %v1453_v22 }
 0x5b4   : > { %v3137_v21 = vpop.eup %2121  ;;  %2135 = vpow2.f32 %v1640_v57  ;;  %1755 = vadd.xlane.f32.xlu1 %v1754_v11 }
 0x5b5   : > { %3392 = vst [vmem:[#allocation12_spill] sm:$0xff] %v3137_v21  ;;  %v3139_v49 = vpop.eup %2123  ;;  %v1634_v31 = vmul.f32 1.442695, %v1524_v17  ;;  %v1636_v5 = vmul.f32 1.442695, %v1525_v42 }
 0x5b6   : > { %v1751_v3 = vadd.f32 %v3139_v49, %v3137_v21 }
 0x5b7   : > { %2137 = vpow2.f32 %v1634_v31 }
 0x5b8   : > { %v3143_v44 = vpop.eup %2125  ;;  %2139 = vpow2.f32 %v1636_v5  ;;  %1752 = vadd.xlane.f32.xlu0 %v1751_v3 }
 0x5b9   : > { %3393 = vst [vmem:[#allocation13_spill] sm:$0xff] %v3143_v44  ;;  %v3145_v23 = vpop.eup %2127 }
 0x5ba   : > { %3394 = vst [vmem:[#allocation14_spill] sm:$0xff] %v3145_v23  ;;  %v1748_v28 = vadd.f32 %v3145_v23, %v3143_v44 }
 0x5bc   : > { %v3149_v22 = vpop.eup %2129  ;;  %1749 = vadd.xlane.f32.xlu1 %v1748_v28 }
 0x5bd   : > { %3395 = vst [vmem:[#allocation15_spill] sm:$0xff] %v3149_v22  ;;  %v3151_v57 = vpop.eup %2131 }
 0x5be   : > { %3396 = vst [vmem:[#allocation16_spill] sm:$0xff] %v3151_v57  ;;  %v1745_v17 = vadd.f32 %v3151_v57, %v3149_v22 }
 0x5c0   : > { %v3155_v42 = vpop.eup %2133  ;;  %1746 = vadd.xlane.f32.xlu0 %v1745_v17 }
 0x5c1   : > { %3397 = vst [vmem:[#allocation17_spill] sm:$0xff] %v3155_v42  ;;  %v3157_v11 = vpop.eup %2135 }
 0x5c2   : > { %3398 = vst [vmem:[#allocation18_spill] sm:$0xff] %v3157_v11  ;;  %v1742_v18 = vadd.f32 %v3157_v11, %v3155_v42 }
 0x5c4   : > { %v3161_v60 = vpop.eup %2137  ;;  %1743 = vadd.xlane.f32.xlu1 %v1742_v18 }
 0x5c5   : > { %3399 = vst [vmem:[#allocation19_spill] sm:$0xff] %v3161_v60  ;;  %v3163_v31 = vpop.eup %2139 }
 0x5c6   : > { %v1739_v5 = vadd.f32 %v3163_v31, %v3161_v60 }
 0x5c8   : > { %1740 = vadd.xlane.f32.xlu0 %v1739_v5 }
 0x5e5   : > { %v1450_v3 = vpop.xlane.xlu0 %1449 }
 0x5e6   : > { %v1522_v28 = vsub.f32 %v2901_v27, %v1450_v3  ;;  %v1523_v22 = vsub.f32 %v2905_v1, %v1450_v3 }
 0x5e8   : > { %v1630_v17 = vmul.f32 1.442695, %v1522_v28  ;;  %v1632_v57 = vmul.f32 1.442695, %v1523_v22 }
 0x5e9   : > { %v1447_v44 = vpop.xlane.xlu0 %1446 }
 0x5ea   : > { %2141 = vpow2.f32 %v1630_v17  ;;  %v1520_v42 = vsub.f32 %v2908_v2, %v1447_v44  ;;  %v1521_v11 = vsub.f32 %v2911_v40, %v1447_v44 }
 0x5eb   : > { %2143 = vpow2.f32 %v1632_v57 }
 0x5ec   : > { %v1626_v18 = vmul.f32 1.442695, %v1520_v42  ;;  %v1628_v23 = vmul.f32 1.442695, %v1521_v11 }
 0x5ed   : > { %v1444_v21 = vpop.xlane.xlu0 %1443 }
 0x5ee   : > { %2145 = vpow2.f32 %v1626_v18  ;;  %v1518_v5 = vsub.f32 %v2922_v10, %v1444_v21  ;;  %v1519_v60 = vsub.f32 %v2925_v58, %v1444_v21 }
 0x5ef   : > { %2147 = vpow2.f32 %v1628_v23 }
 0x5f0   : > { %v1622_v27 = vmul.f32 1.442695, %v1518_v5  ;;  %v1624_v1 = vmul.f32 1.442695, %v1519_v60 }
 0x5f1   : > { %v1441_v3 = vpop.xlane.xlu0 %1440 }
 0x5f2   : > { %2149 = vpow2.f32 %v1622_v27  ;;  %v1516_v22 = vsub.f32 %v2936_v53, %v1441_v3  ;;  %v1517_v2 = vsub.f32 %v2939_v45, %v1441_v3 }
 0x5f3   : > { %2151 = vpow2.f32 %v1624_v1 }
 0x5f4   : > { %v1717_v40 = vpop.xlane.xlu1 %1716  ;;  %v1618_v44 = vmul.f32 1.442695, %v1516_v22  ;;  %v1620_v57 = vmul.f32 1.442695, %v1517_v2 }
 0x5f5   : > { %2153 = vrcp.f32 %v1717_v40  ;;  %v1438_v42 = vpop.xlane.xlu0 %1437 }
 0x5f6   : > { %2155 = vpow2.f32 %v1618_v44  ;;  %v1514_v10 = vsub.f32 %v2950_v50, %v1438_v42  ;;  %v1515_v58 = vsub.f32 %v2953_v7, %v1438_v42 }
 0x5f7   : > { %v3177_v21 = vpop.eup %2141  ;;  %2157 = vpow2.f32 %v1620_v57 }
 0x5f8   : > { %v1714_v23 = vpop.xlane.xlu1 %1713  ;;  %v3179_v11 = vpop.eup %2143  ;;  %v1614_v53 = vmul.f32 1.442695, %v1514_v10  ;;  %v1616_v60 = vmul.f32 1.442695, %v1515_v58 }
 0x5f9   : > { %2159 = vrcp.f32 %v1714_v23  ;;  %v1435_v45 = vpop.xlane.xlu0 %1434  ;;  %v1736_v28 = vadd.f32 %v3179_v11, %v3177_v21 }
 0x5fa   : > { %2161 = vpow2.f32 %v1614_v53  ;;  %v1512_v17 = vsub.f32 %v2970_v43, %v1435_v45  ;;  %v1513_v50 = vsub.f32 %v2973_v59, %v1435_v45 }
 0x5fb   : > { %v3185_v18 = vpop.eup %2145  ;;  %2163 = vpow2.f32 %v1616_v60  ;;  %1737 = vadd.xlane.f32.xlu1 %v1736_v28 }
 0x5fc   : > { %v1711_v7 = vpop.xlane.xlu1 %1710  ;;  %v3187_v5 = vpop.eup %2147  ;;  %v1610_v27 = vmul.f32 1.442695, %v1512_v17  ;;  %v1612_v1 = vmul.f32 1.442695, %v1513_v50 }
 0x5fd   : > { %2165 = vrcp.f32 %v1711_v7  ;;  %v1432_v3 = vpop.xlane.xlu0 %1431  ;;  %v1733_v22 = vadd.f32 %v3187_v5, %v3185_v18 }
 0x5fe   : > { %2167 = vpow2.f32 %v1610_v27  ;;  %v1510_v2 = vsub.f32 %v2988_v37, %v1432_v3  ;;  %v1511_v43 = vsub.f32 %v2991_v55, %v1432_v3 }
 0x5ff   : > { %v3193_v59 = vpop.eup %2149  ;;  %2169 = vpow2.f32 %v1612_v1  ;;  %1734 = vadd.xlane.f32.xlu0 %v1733_v22 }
 0x600   : > { %v1708_v40 = vpop.xlane.xlu1 %1707  ;;  %v3195_v44 = vpop.eup %2151  ;;  %v1606_v57 = vmul.f32 1.442695, %v1510_v2  ;;  %v1608_v42 = vmul.f32 1.442695, %v1511_v43 }
 0x601   : > { %2171 = vrcp.f32 %v1708_v40  ;;  %v1730_v58 = vadd.f32 %v3195_v44, %v3193_v59 }
 0x602   : > { %v2154_v10 = vpop.eup %2153  ;;  %2173 = vpow2.f32 %v1606_v57 }
 0x603   : > { %v1829_v23 = vmul.f32 %v2154_v10, %v2955_v63  ;;  %v1828_v37 = vmul.f32 %v2154_v10, %v2945_v62  ;;  %v3201_v55 = vpop.eup %2155  ;;  %2175 = vpow2.f32 %v1608_v42  ;;  %1731 = vadd.xlane.f32.xlu1 %v1730_v58 }
 0x604   : > { %v1705_v53 = vpop.xlane.xlu1 %1704  ;;  %v3203_v60 = vpop.eup %2157 }
 0x605   : > { %1862 = vmatprep.subr.mxu1 %v1829_v23  ;;  %2177 = vrcp.f32 %v1705_v53  ;;  %v1727_v28 = vadd.f32 %v3203_v60, %v3201_v55 }
 0x606   : > { %v2160_v45 = vpop.eup %2159  ;;  %1863 = vmatpush1.xpose.msra.mxu1 %v1828_v37 }
 0x607   : > { %v1827_v17 = vmul.f32 %v2160_v45, %v2965_v0  ;;  %v1826_v63 = vmul.f32 %v2160_v45, %v2959_v20  ;;  %v3209_v50 = vpop.eup %2161  ;;  %1728 = vadd.xlane.f32.xlu0 %v1727_v28  ;;  %v1687_v45 = vpop.xlane.xlu0 %1686 }
 0x608   : > { %v1702_v62 = vpop.xlane.xlu1 %1701  ;;  %v3211_v7 = vpop.eup %2163 }
 0x609   : > { %2179 = vrcp.f32 %v1702_v62  ;;  %1864 = vmatprep.subr.mxu1 %v1827_v17  ;;  %v1724_v1 = vadd.f32 %v3211_v7, %v3209_v50 }
 0x60a   : > { %v2166_v27 = vpop.eup %2165  ;;  %1865 = vmatpush1.xpose.msra.mxu1 %v1826_v63 }
 0x60b   : > { %v1825_v3 = vmul.f32 %v2166_v27, %v2983_v48  ;;  %v1824_v22 = vmul.f32 %v2166_v27, %v2977_v52  ;;  %v3217_v0 = vpop.eup %2167  ;;  %1725 = vadd.xlane.f32.xlu1 %v1724_v1 }
 0x60c   : > { %v1699_v20 = vpop.xlane.xlu1 %1698  ;;  %v3219_v2 = vpop.eup %2169 }
 0x60d   : > { %2181 = vrcp.f32 %v1699_v20  ;;  %1866 = vmatprep.subr.mxu1 %v1825_v3  ;;  %v1721_v40 = vadd.f32 %v3219_v2, %v3217_v0  ;;  %v1681_v3 = vpop.xlane.xlu0 %1680 }
 0x60e   : > { %v2172_v43 = vpop.eup %2171  ;;  %1867 = vmatpush1.xpose.msra.mxu1 %v1824_v22 }
 0x60f   : > { %v1823_v57 = vmul.f32 %v2172_v43, %v3001_v61  ;;  %v1822_v42 = vmul.f32 %v2172_v43, %v2995_v9  ;;  %v3225_v48 = vpop.eup %2173  ;;  %1722 = vadd.xlane.f32.xlu0 %v1721_v40 }
 0x610   : > { %v1696_v52 = vpop.xlane.xlu1 %1695  ;;  %v3227_v10 = vpop.eup %2175 }
 0x611   : > { %2183 = vrcp.f32 %v1696_v52  ;;  %1868 = vmatprep.subr.mxu1 %v1823_v57  ;;  %v1718_v58 = vadd.f32 %v3227_v10, %v3225_v48 }
 0x612   : > { %1869 = vmatpush1.xpose.msra.mxu1 %v1822_v42  ;;  %v2178_v23 = vpop.eup %2177 }
 0x613   : > { %1719 = vadd.xlane.f32.xlu1 %v1718_v58  ;;  %v1821_v53 = vmul.f32 %v2178_v23, %v3017_v8  ;;  %v1820_v61 = vmul.f32 %v2178_v23, %v3011_v34 }
 0x614   : > { %v1693_v37 = vpop.xlane.xlu1 %1692 }
 0x615   : > { %2185 = vrcp.f32 %v1693_v37  ;;  %1870 = vmatprep.subr.mxu1 %v1821_v53  ;;  %v1933_v53 = vld [vmem:[#allocation4] sm:$0x1] }
 0x616   : > { %v2180_v9 = vpop.eup %2179  ;;  %1871 = vmatpush1.xpose.msra.mxu1 %v1820_v61  ;;  %2019 = vpush %v1933_v53  ;;  %v3408_v53 = vld [vmem:[#allocation16_spill] sm:$0xff] }
 0x617   : > { %v1819_v28 = vmul.f32 %v2180_v9, %v3033_v36  ;;  %v1818_v17 = vmul.f32 %v2180_v9, %v3027_v25 }
 0x618   : > { %v1690_v63 = vpop.xlane.xlu1 %1689 }
 0x619   : > { %2187 = vrcp.f32 %v1690_v63  ;;  %1872 = vmatprep.subr.mxu1 %v1819_v28 }
 0x61a   : > { %v2182_v62 = vpop.eup %2181  ;;  %2189 = vrcp.f32 %v1687_v45  ;;  %1873 = vmatpush1.xpose.msra.mxu1 %v1818_v17 }
 0x61b   : > { %v1817_v27 = vmul.f32 %v2182_v62, %v3045_v39  ;;  %v1816_v8 = vmul.f32 %v2182_v62, %v3041_v56  ;;  %v1006_v39 = vld [vmem:[%s3313_s12] sm:$0xff] }
 0x61c   : > { %v1684_v34 = vpop.xlane.xlu1 %1683 }
 0x61d   : > { %1874 = vmatprep.subr.mxu1 %v1817_v27  ;;  %2191 = vrcp.f32 %v1684_v34 }
 0x61e   : > { %v2184_v1 = vpop.eup %2183  ;;  %1875 = vmatpush1.xpose.msra.mxu1 %v1816_v8  ;;  %2193 = vrcp.f32 %v1681_v3  ;;  %v3401_v3 = vld [vmem:[#allocation9_spill] sm:$0xff] }
 0x61f   : > { %v1815_v36 = vmul.f32 %v2184_v1, %v3051_v41  ;;  %v1814_v25 = vmul.f32 %v2184_v1, %v3047_v14 }
 0x620   : > { %v1678_v20 = vpop.xlane.xlu1 %1677 }
 0x621   : > { %1876 = vmatprep.subr.mxu1 %v1815_v36  ;;  %2195 = vrcp.f32 %v1678_v20 }
 0x622   : > { %v2186_v22 = vpop.eup %2185  ;;  %1877 = vmatpush1.xpose.msra.mxu1 %v1814_v25 }
 0x623   : > { %v1813_v56 = vmul.f32 %v2186_v22, %v3057_v33  ;;  %v1812_v43 = vmul.f32 %v2186_v22, %v3053_v15 }
 0x625   : > { %1878 = vmatprep.subr.mxu1 %v1813_v56  ;;  %1009 = vperm.xlu0 %2039, %v1006_v39  }
 0x626   : > { %v2188_v40 = vpop.eup %2187  ;;  %1879 = vmatpush1.xpose.msra.mxu1 %v1812_v43  ;;  %v3404_v43 = vld [vmem:[#allocation10_spill] sm:$0xff] }
 0x627   : > { %v2190_v41 = vpop.eup %2189  ;;  %v1811_v14 = vmul.f32 %v2188_v40, %v3063_v16  ;;  %v1810_v57 = vmul.f32 %v2188_v40, %v3059_v24 }
 0x628   : > { %v1809_v42 = vmul.f32 %v2190_v41, %v3007_v19  ;;  %v1808_v33 = vmul.f32 %v2190_v41, %v3003_v13 }
 0x629   : > { %1880 = vmatprep.subr.mxu1 %v1811_v14 }
 0x62a   : > { %v2192_v52 = vpop.eup %2191  ;;  %1881 = vmatpush1.xpose.msra.mxu1 %v1810_v57 }
 0x62b   : > { %1882 = vmatprep.subr.mxu1 %v1809_v42  ;;  %v1807_v15 = vmul.f32 %v2192_v52, %v3069_v26  ;;  %v2194_v23 = vpop.eup %2193  ;;  %v1806_v16 = vmul.f32 %v2192_v52, %v3065_v51 }
 0x62c   : > { %v1805_v24 = vmul.f32 %v2194_v23, %v3023_v54  ;;  %v1804_v13 = vmul.f32 %v2194_v23, %v3019_v30  ;;  %v3406_v23 = vld [vmem:[#allocation14_spill] sm:$0xff] }
 0x62d   : > { %v1675_v58 = vpop.xlane.xlu0 %1674 }
 0x62e   : > { %2197 = vrcp.f32 %v1675_v58  ;;  %1883 = vmatpush1.xpose.msra.mxu1 %v1808_v33  ;;  %v2196_v61 = vpop.eup %2195  ;;  %v3405_v33 = vld [vmem:[#allocation12_spill] sm:$0xff] }
 0x62f   : > { %1884 = vmatprep.subr.mxu1 %v1807_v15  ;;  %v1803_v26 = vmul.f32 %v2196_v61, %v3075_v46  ;;  %v1802_v51 = vmul.f32 %v2196_v61, %v3073_v4 }
 0x631   : > { %v1765_v37 = vpop.xlane.xlu0 %1764 }
 0x632   : > { %2199 = vrcp.f32 %v1765_v37  ;;  %1885 = vmatpush1.xpose.msra.mxu1 %v1806_v16 }
 0x633   : > { %v1672_v19 = vpop.xlane.xlu1 %1671  ;;  %1886 = vmatprep.subr.mxu1 %v1805_v24 }
 0x634   : > { %2201 = vrcp.f32 %v1672_v19 }
 0x636   : > { %1887 = vmatpush1.xpose.msra.mxu1 %v1804_v13 }
 0x637   : > { %v1762_v9 = vpop.xlane.xlu1 %1761  ;;  %1888 = vmatprep.subr.mxu1 %v1803_v26 }
 0x638   : > { %2203 = vrcp.f32 %v1762_v9 }
 0x639   : > { %v1759_v45 = vpop.xlane.xlu0 %1758 }
 0x63a   : > { %1889 = vmatpush1.xpose.msra.mxu1 %v1802_v51  ;;  %2205 = vrcp.f32 %v1759_v45  ;;  %v3411_v45 = vld [vmem:[#allocation17_spill] sm:$0xff] }
 0x63b   : > { %v2198_v54 = vpop.eup %2197 }
 0x63c   : > { %v1801_v28 = vmul.f32 %v2198_v54, %v3093_v12  ;;  %v1800_v17 = vmul.f32 %v2198_v54, %v3091_v6  ;;  %v3400_v6 = vld [vmem:[#allocation7_spill] sm:$0xff] }
 0x63d   : > { %v1756_v63 = vpop.xlane.xlu1 %1755 }
 0x63e   : > { %1890 = vmatprep.subr.mxu1 %v1801_v28  ;;  %2207 = vrcp.f32 %v1756_v63  ;;  %v3412_v28 = vld [vmem:[#allocation19_spill] sm:$0xff] }
 0x63f   : > { %1891 = vmatpush1.xpose.msra.mxu1 %v1800_v17  ;;  %v2200_v30 = vpop.eup %2199 }
 0x640   : > { %v1861_v4 = vmul.f32 %v2200_v30, %v3101_v47  ;;  %v1860_v1 = vmul.f32 %v2200_v30, %v3400_v6 }
 0x641   : > { %v2202_v46 = vpop.eup %2201  ;;  %v1753_v62 = vpop.xlane.xlu0 %1752 }
 0x642   : > { %v1799_v27 = vmul.f32 %v2202_v46, %v3107_v29  ;;  %v1798_v8 = vmul.f32 %v2202_v46, %v3103_v35  ;;  %2209 = vrcp.f32 %v1753_v62  ;;  %v3402_v29 = vld [vmem:[#allocation8_spill] sm:$0xff]  ;;  %v3403_v35 = vld [vmem:[#allocation11_spill] sm:$0xff] }
 0x644   : > { %1892 = vmatprep.subr.mxu1 %v1799_v27 }
 0x645   : > { %v2204_v34 = vpop.eup %2203  ;;  %1893 = vmatpush1.xpose.msra.mxu1 %v1798_v8  ;;  %v1750_v12 = vpop.xlane.xlu1 %1749 }
 0x646   : > { %1894 = vmatprep.subr.mxu1 %v1861_v4  ;;  %2211 = vrcp.f32 %v1750_v12  ;;  %v1859_v36 = vmul.f32 %v2204_v34, %v3401_v3  ;;  %v1858_v20 = vmul.f32 %v2204_v34, %v3402_v29 }
 0x647   : > { %v2206_v25 = vpop.eup %2205  ;;  %s2020_s13 = spop %2019 }
 0x648   : > { %v1857_v39 = vmul.f32 %v2206_v25, %v3403_v35  ;;  %v1856_v40 = vmul.f32 %v2206_v25, %v3404_v43 }
 0x649   : > { %v1747_v22 = vpop.xlane.xlu0 %1746  ;;  %1895 = vmatpush2.xpose.msra.mxu1 %v1860_v1 }
 0x64a   : > { %1896 = vmatprep.subr.mxu1 %v1859_v36  ;;  %2213 = vrcp.f32 %v1747_v22  ;;  %v1081_v36 = vpop.f32.mrf.mxu0 }
 0x64b   : > { %v2208_v56 = vpop.eup %2207 }
 0x64c   : > { %v1855_v41 = vmul.f32 %v2208_v56, %v3131_v38  ;;  %v1854_v42 = vmul.f32 %v2208_v56, %v3129_v32  ;;  %v3407_v38 = vld [vmem:[#allocation13_spill] sm:$0xff]  ;;  %v3409_v32 = vld [vmem:[#allocation15_spill] sm:$0xff]  ;;  %v1083_v29 = vpop.f32.mrf.mxu0 }
 0x64d   : > { %1897 = vmatpush2.xpose.msra.mxu1 %v1858_v20  ;;  %v1744_v47 = vpop.xlane.xlu1 %1743 }
 0x64e   : > { %1898 = vmatprep.subr.mxu1 %v1857_v39  ;;  %2215 = vrcp.f32 %v1744_v47 }
 0x64f   : > { %v2210_v14 = vpop.eup %2209 }
 0x650   : > { %v1853_v52 = vmul.f32 %v2210_v14, %v3139_v49  ;;  %v1852_v15 = vmul.f32 %v2210_v14, %v3405_v33  ;;  %v3410_v49 = vld [vmem:[#allocation18_spill] sm:$0xff]  ;;  %v3414_v33 = vld [vmem:[#allocation5_spill] sm:$0xff] }
 0x651   : > { %v1741_v57 = vpop.xlane.xlu0 %1740  ;;  %1899 = vmatpush2.xpose.msra.mxu1 %v1856_v40 }
 0x652   : > { %1900 = vmatprep.subr.mxu1 %v1855_v41  ;;  %2217 = vrcp.f32 %v1741_v57 }
 0x653   : > { %v2212_v58 = vpop.eup %2211 }
 0x654   : > { %v1851_v37 = vmul.f32 %v2212_v58, %v3406_v23  ;;  %v1850_v24 = vmul.f32 %v2212_v58, %v3407_v38 }
 0x655   : > { %1901 = vmatpush2.xpose.msra.mxu1 %v1854_v42 }
 0x656   : > { %1902 = vmatprep.subr.mxu1 %v1853_v52  ;;  %v2233_v52 = vld [vmem:[%s2354_s21] sm:$0xff] }
 0x657   : > { %v2214_v16 = vpop.eup %2213 }
 0x658   : > { %v1849_v61 = vmul.f32 %v2214_v16, %v3408_v53  ;;  %v1848_v13 = vmul.f32 %v2214_v16, %v3409_v32 }
 0x659   : > { %1903 = vmatpush2.xpose.msra.mxu1 %v1852_v15  ;;  %v2234_v15 = vld [vmem:[%s2354_s21 + $0x8] sm:$0xff] }
 0x65a   : > { %1904 = vmatprep.subr.mxu1 %v1851_v37 }
 0x65b   : > { %v2216_v19 = vpop.eup %2215 }
 0x65c   : > { %v1847_v26 = vmul.f32 %v2216_v19, %v3410_v49  ;;  %v1846_v51 = vmul.f32 %v2216_v19, %v3411_v45 }
 0x65d   : > { %1905 = vmatpush2.xpose.msra.mxu1 %v1850_v24 }
 0x65e   : > { %1906 = vmatprep.subr.mxu1 %v1849_v61 }
 0x65f   : > { %v2218_v9 = vpop.eup %2217 }
 0x660   : > { %v1845_v54 = vmul.f32 %v2218_v9, %v3163_v31  ;;  %v1844_v17 = vmul.f32 %v2218_v9, %v3412_v28 }
 0x661   : > { %1907 = vmatpush2.xpose.msra.mxu1 %v1848_v13 }
 0x662   : > { %1908 = vmatprep.subr.mxu1 %v1847_v26 }
 0x665   : > { %1909 = vmatpush2.xpose.msra.mxu1 %v1846_v51 }
 0x666   : > { %1910 = vmatprep.subr.mxu1 %v1845_v54 }
 0x669   : > { %1911 = vmatpush2.xpose.msra.mxu1 %v1844_v17 }
 0x684   : > { %v1738_v63 = vpop.xlane.xlu1 %1737 }
 0x685   : > { %2219 = vrcp.f32 %v1738_v63 }
 0x688   : > { %v1735_v30 = vpop.xlane.xlu0 %1734 }
 0x689   : > { %2221 = vrcp.f32 %v1735_v30 }
 0x68c   : > { %v1732_v46 = vpop.xlane.xlu1 %1731 }
 0x68d   : > { %2223 = vrcp.f32 %v1732_v46 }
 0x690   : > { %v1729_v62 = vpop.xlane.xlu0 %1728 }
 0x691   : > { %2225 = vrcp.f32 %v1729_v62 }
 0x692   : > { %v2220_v27 = vpop.eup %2219 }
 0x693   : > { %v1843_v8 = vmul.f32 %v2220_v27, %v3179_v11  ;;  %v1842_v4 = vmul.f32 %v2220_v27, %v3177_v21 }
 0x694   : > { %v1726_v34 = vpop.xlane.xlu1 %1725 }
 0x695   : > { %2227 = vrcp.f32 %v1726_v34  ;;  %1912 = vmatprep.subr.mxu1 %v1843_v8 }
 0x696   : > { %v2222_v31 = vpop.eup %2221  ;;  %1913 = vmatpush2.xpose.msra.mxu1 %v1842_v4 }
 0x697   : > { %v1841_v12 = vmul.f32 %v2222_v31, %v3187_v5  ;;  %v1840_v6 = vmul.f32 %v2222_v31, %v3185_v18 }
 0x698   : > { %v1723_v1 = vpop.xlane.xlu0 %1722 }
 0x699   : > { %2229 = vrcp.f32 %v1723_v1  ;;  %1914 = vmatprep.subr.mxu1 %v1841_v12 }
 0x69a   : > { %v2224_v3 = vpop.eup %2223  ;;  %1915 = vmatpush2.xpose.msra.mxu1 %v1840_v6 }
 0x69b   : > { %v1839_v25 = vmul.f32 %v2224_v3, %v3195_v44  ;;  %v1838_v11 = vmul.f32 %v2224_v3, %v3193_v59 }
 0x69c   : > { %v1720_v21 = vpop.xlane.xlu1 %1719 }
 0x69d   : > { %2231 = vrcp.f32 %v1720_v21  ;;  %1916 = vmatprep.subr.mxu1 %v1839_v25 }
 0x69e   : > { %v2226_v22 = vpop.eup %2225  ;;  %1917 = vmatpush2.xpose.msra.mxu1 %v1838_v11 }
 0x69f   : > { %v1837_v5 = vmul.f32 %v2226_v22, %v3203_v60  ;;  %v1836_v18 = vmul.f32 %v2226_v22, %v3201_v55 }
 0x6a0   : > { %v1010_v20 = vpop.permute.xlu0 %1009 }
 0x6a1   : > { %1918 = vmatprep.subr.mxu1 %v1837_v5  ;;  %v1084_v35 = vadd.f32 %v1083_v29, %v1010_v20 }
 0x6a2   : > { %v2228_v39 = vpop.eup %2227  ;;  %1919 = vmatpush2.xpose.msra.mxu1 %v1836_v18 }
 0x6a3   : > { %1926 = vmatprep.mubr.f32.mxu1 %v1084_v35  ;;  %v1835_v44 = vmul.f32 %v2228_v39, %v3211_v7  ;;  %v1834_v59 = vmul.f32 %v2228_v39, %v3209_v50  ;;  %v1082_v50 = vadd.f32 %v1081_v36, %v1010_v20  ;;  %v1935_v7 = vstv %s2020_s13 }
 0x6a5   : > { %1920 = vmatprep.subr.mxu1 %v1835_v44 }
 0x6a6   : > { %v2230_v56 = vpop.eup %2229  ;;  %1921 = vmatpush2.xpose.msra.mxu1 %v1834_v59 }
 0x6a7   : > { %v1833_v47 = vmul.f32 %v2230_v56, %v3219_v2  ;;  %v1832_v43 = vmul.f32 %v2230_v56, %v3217_v0  ;;  %v3413_v0 = vld [vmem:[#allocation6_spill] sm:$0xff] }
 0x6a9   : > { %1922 = vmatprep.subr.mxu1 %v1833_v47 }
 0x6aa   : > { %v2232_v55 = vpop.eup %2231  ;;  %1923 = vmatpush2.xpose.msra.mxu1 %v1832_v43 }
 0x6ab   : > { %v1831_v60 = vmul.f32 %v2232_v55, %v3227_v10  ;;  %v1830_v40 = vmul.f32 %v2232_v55, %v3225_v48 }
 0x6ad   : > { %1924 = vmatprep.subr.mxu1 %v1831_v60 }
 0x6ae   : > { %1925 = vmatpush2.xpose.msra.mxu1 %v1830_v40 }
 0x6b1   : > { %1927 = vmatmul.mubr.f32.vlgmr.msra.gmra.mxu1 %v1082_v50 }
 0x771   : > { %v1928_v41 = vpop.f32.mrf.mxu1 }
 0x772   : > { %v1936_v2 = vmul.f32 %v1935_v7, %v1928_v41 }
 0x773   : > { %v1930_v14 = vpop.f32.mrf.mxu1 }
 0x774   : > { %v1938_v57 = vadd.f32 %v1936_v2, %v3413_v0  ;;  %v1937_v42 = vmul.f32 %v1935_v7, %v1930_v14 }
 0x776   : > { %v1940_v58 = vadd.f32 %v2233_v52, %v1938_v57  ;;  %v1939_v10 = vadd.f32 %v1937_v42, %v3414_v33 }
 0x778   : > { %v1942_v48 = vmax.f32 %v1940_v58, 0.0  ;;  %v1941_v23 = vadd.f32 %v2234_v15, %v1939_v10 }
 0x77a   : > { %1944 = vst [vmem:[%s473_s23] sm:$0xff] %v1942_v48  ;;  %v1943_v37 = vmax.f32 %v1941_v23, 0.0 }
 0x77c   : > { %1945 = vst [vmem:[%s473_s23 + $0x8] sm:$0xff] %v1943_v37 }
 0x77d PF: > { %s30_s19 = sadd.s32 1, %s2241_s19  }
 0x77e   : > { %p27_p4 = scmp.ge.s32.totalorder %s30_s19, 4  }
 0x780   :  { %29 = sbr.rel (!%p27_p4) target bundleno = 4 (0x4), region = 106 }

</bundles_post_ra>
